<compile_context>
chip_gen: v7x
topology: tpu7x:2x2x1
jax: 0.10.0
libtpu: 0.0.40
codegen_flags: <defaults>
</compile_context>

<pallas_src>
import functools
import jax
import jax.numpy as jnp
from jax.experimental import pallas as pl
from jax.experimental.pallas import tpu as pltpu

LN_EPS = 1e-5


def _layernorm(x, g, b):
    mu = jnp.mean(x, axis=-1, keepdims=True)
    var = jnp.mean((x - mu) ** 2, axis=-1, keepdims=True)
    return (x - mu) * jax.lax.rsqrt(var + LN_EPS) * g + b


# ----------------------------- fused stack kernel -----------------------------

def encoder_stack_kernel(tok_ref, pos_ref,
                         ln1g_ref, ln1b_ref, wqkv_ref, wo_ref, bo_ref,
                         ln2g_ref, ln2b_ref, w1_ref, b1_ref, w2_ref, b2_ref,
                         fg_ref, fb_ref,
                         o_ref, x_scr,
                         *, batch, seq, heads, dim_head):
    layer = pl.program_id(0)
    inner = heads * dim_head
    n_tok = batch * seq
    scale = dim_head ** -0.5

    # ---- layer 0: fused embedding add (token gather done host-side; pos broadcast on-chip)
    @pl.when(layer == 0)
    def _():
        x_scr[...] = tok_ref[...] + jnp.tile(pos_ref[...], (batch, 1))

    x = x_scr[...]                                              # (N, D) f32, N = B*S

    # ---- self-attention: x = x + Wo @ MHSA(LN(x)) + bo --------------------------------
    h = _layernorm(x, ln1g_ref[0], ln1b_ref[0])
    qkv = jnp.dot(h.astype(jnp.bfloat16), wqkv_ref[0],          # single fused QKV matmul
                  preferred_element_type=jnp.float32)           # (N, 3*inner) f32
    q = qkv[:, 0 * inner:1 * inner].reshape(batch, seq, inner).astype(jnp.bfloat16)
    k = qkv[:, 1 * inner:2 * inner].reshape(batch, seq, inner).astype(jnp.bfloat16)
    v = qkv[:, 2 * inner:3 * inner].reshape(batch, seq, inner).astype(jnp.bfloat16)

    ctx_heads = []
    for hd in range(heads):                                     # static unroll: softmax per head
        sl = slice(hd * dim_head, (hd + 1) * dim_head)
        qh, kh, vh = q[:, :, sl], k[:, :, sl], v[:, :, sl]      # (B, S, dh) bf16
        logits = jnp.einsum('bqd,bkd->bqk', qh, kh,
                            preferred_element_type=jnp.float32) * scale
        logits = logits - jnp.max(logits, axis=-1, keepdims=True)
        p = jnp.exp(logits)                                     # f32 softmax on VPU/EUP
        p = p * pl.reciprocal(jnp.sum(p, axis=-1, keepdims=True), approx=True)
        ctx_heads.append(jnp.einsum('bqk,bkd->bqd', p.astype(jnp.bfloat16), vh,
                                    preferred_element_type=jnp.float32))
    ctx = jnp.concatenate(ctx_heads, axis=-1).reshape(n_tok, inner)   # (N, inner)
    attn = jnp.dot(ctx.astype(jnp.bfloat16), wo_ref[0],         # ONE K=inner output projection
                   preferred_element_type=jnp.float32) + bo_ref[0]
    x = x + attn

    # ---- feed-forward: x = x + W2 @ GELU(W1 @ LN(x) + b1) + b2 ------------------------
    h2 = _layernorm(x, ln2g_ref[0], ln2b_ref[0])
    ff = jnp.dot(h2.astype(jnp.bfloat16), w1_ref[0],
                 preferred_element_type=jnp.float32) + b1_ref[0]
    # TODO(synk): nn.GELU() is exact (erf) GELU; tanh-approx GELU used here (EUP-friendly).
    ff = jax.nn.gelu(ff, approximate=True)
    ff = jnp.dot(ff.astype(jnp.bfloat16), w2_ref[0],
                 preferred_element_type=jnp.float32) + b2_ref[0]
    x = x + ff

    x_scr[...] = x                                              # carried to the next layer

    # ---- last layer: fused final LayerNorm + output store -----------------------------
    @pl.when(layer == pl.num_programs(0) - 1)
    def _():
        o_ref[...] = _layernorm(x, fg_ref[...], fb_ref[...]).astype(o_ref.dtype)


# ----------------------------- params & wrapper --------------------------------

def init_params(key, *, vocab_size, max_seq_len, dim, depth,
                heads=8, dim_head=64, ff_mult=4):
    inner = heads * dim_head
    ff_inner = dim * ff_mult
    keys = jax.random.split(key, 6)

    def nrm(k, shape, std, dtype=jnp.float32):
        return (jax.random.normal(k, shape, jnp.float32) * std).astype(dtype)

    return {
        'tok_emb': nrm(keys[0], (vocab_size, dim), 0.02),
        'pos_emb': nrm(keys[1], (max_seq_len, dim), 0.02),
        # per-layer weights stacked along a leading depth axis (streamed by the layer grid axis)
        'ln1_g': jnp.ones((depth, 1, dim), jnp.float32),
        'ln1_b': jnp.zeros((depth, 1, dim), jnp.float32),
        'wqkv': nrm(keys[2], (depth, dim, 3 * inner), dim ** -0.5, jnp.bfloat16),
        'wo':   nrm(keys[3], (depth, inner, dim), inner ** -0.5, jnp.bfloat16),
        'bo':   jnp.zeros((depth, 1, dim), jnp.float32),
        'ln2_g': jnp.ones((depth, 1, dim), jnp.float32),
        'ln2_b': jnp.zeros((depth, 1, dim), jnp.float32),
        'w1': nrm(keys[4], (depth, dim, ff_inner), dim ** -0.5, jnp.bfloat16),
        'b1': jnp.zeros((depth, 1, ff_inner), jnp.float32),
        'w2': nrm(keys[5], (depth, ff_inner, dim), ff_inner ** -0.5, jnp.bfloat16),
        'b2': jnp.zeros((depth, 1, dim), jnp.float32),
        'final_ln_g': jnp.ones((1, dim), jnp.float32),
        'final_ln_b': jnp.zeros((1, dim), jnp.float32),
    }


def transformer_embedder_forward(params, tokens, *, heads=8, dim_head=64):
    B, S = tokens.shape
    D = params['tok_emb'].shape[1]
    depth = params['wqkv'].shape[0]
    inner = heads * dim_head
    ff_inner = params['w1'].shape[-1]
    N = B * S
    assert S <= params['pos_emb'].shape[0], "sequence length exceeds max_seq_len"

    # glue: data-dependent embedding gather stays in plain JAX; kernel gets a flat (N, D) slab
    tok = jnp.take(params['tok_emb'], tokens.reshape(-1), axis=0)   # (N, D)
    pos = params['pos_emb'][:S]                                     # (S, D) — broadcast on-chip

    const = lambda *_: (0, 0)
    per_layer = lambda l: (l, 0, 0)

    grid_spec = pltpu.PrefetchScalarGridSpec(
        num_scalar_prefetch=0,
        grid=(depth,),
        in_specs=[
            pl.BlockSpec((N, D), const),                  # tok
            pl.BlockSpec((S, D), const),                  # pos
            pl.BlockSpec((1, 1, D), per_layer),           # ln1_g
            pl.BlockSpec((1, 1, D), per_layer),           # ln1_b
            pl.BlockSpec((1, D, 3 * inner), per_layer),   # wqkv (fused)
            pl.BlockSpec((1, inner, D), per_layer),       # wo
            pl.BlockSpec((1, 1, D), per_layer),           # bo
            pl.BlockSpec((1, 1, D), per_layer),           # ln2_g
            pl.BlockSpec((1, 1, D), per_layer),           # ln2_b
            pl.BlockSpec((1, D, ff_inner), per_layer),    # w1
            pl.BlockSpec((1, 1, ff_inner), per_layer),    # b1
            pl.BlockSpec((1, ff_inner, D), per_layer),    # w2
            pl.BlockSpec((1, 1, D), per_layer),           # b2
            pl.BlockSpec((1, D), const),                  # final_ln_g
            pl.BlockSpec((1, D), const),                  # final_ln_b
        ],
        out_specs=pl.BlockSpec((N, D), const),
        scratch_shapes=[pltpu.VMEM((N, D), jnp.float32)],  # activation resident across layers
    )

    kernel = functools.partial(encoder_stack_kernel, batch=B, seq=S,
                               heads=heads, dim_head=dim_head)
    z = pl.pallas_call(
        kernel,
        out_shape=jax.ShapeDtypeStruct((N, D), jnp.float32),
        grid_spec=grid_spec,
        compiler_params=pltpu.CompilerParams(dimension_semantics=("arbitrary",)),
    )(tok, pos,
      params['ln1_g'], params['ln1_b'], params['wqkv'], params['wo'], params['bo'],
      params['ln2_g'], params['ln2_b'], params['w1'], params['b1'],
      params['w2'], params['b2'], params['final_ln_g'], params['final_ln_b'])
    return z.reshape(B, S, D)


if __name__ == "__main__":
    # TransformerEmbedder(n_embed=32, n_layer=2, vocab_size=64, max_seq_len=16)
    n_embed, n_layer, vocab_size, max_seq_len = 32, 2, 64, 16
    B, S = 2, 8

    key = jax.random.PRNGKey(0)
    pkey, tkey = jax.random.split(key)
    params = init_params(pkey, vocab_size=vocab_size, max_seq_len=max_seq_len,
                         dim=n_embed, depth=n_layer)
    tokens = jax.random.randint(tkey, (B, S), 0, vocab_size, dtype=jnp.int32)

    z = transformer_embedder_forward(params, tokens)
    jax.block_until_ready(z)
    assert z.shape == (B, S, n_embed) and z.dtype == jnp.float32
    print("KERNEL_OK")
</pallas_src>

<mosaic_0001>
module attributes {stable_mosaic.version = 11 : i64} {
  func.func @encoder_stack_kernel(%arg0: i32, %arg1: memref<16x32xf32, #tpu.memory_space<vmem>>, %arg2: memref<8x32xf32, #tpu.memory_space<vmem>>, %arg3: memref<1x1x32xf32, #tpu.memory_space<vmem>>, %arg4: memref<1x1x32xf32, #tpu.memory_space<vmem>>, %arg5: memref<1x32x1536xbf16, #tpu.memory_space<vmem>>, %arg6: memref<1x512x32xbf16, #tpu.memory_space<vmem>>, %arg7: memref<1x1x32xf32, #tpu.memory_space<vmem>>, %arg8: memref<1x1x32xf32, #tpu.memory_space<vmem>>, %arg9: memref<1x1x32xf32, #tpu.memory_space<vmem>>, %arg10: memref<1x32x128xbf16, #tpu.memory_space<vmem>>, %arg11: memref<1x1x128xf32, #tpu.memory_space<vmem>>, %arg12: memref<1x128x32xbf16, #tpu.memory_space<vmem>>, %arg13: memref<1x1x32xf32, #tpu.memory_space<vmem>>, %arg14: memref<1x32xf32, #tpu.memory_space<vmem>>, %arg15: memref<1x32xf32, #tpu.memory_space<vmem>>, %arg16: memref<16x32xf32, #tpu.memory_space<vmem>>, %arg17: memref<16x32xf32, #tpu.memory_space<vmem>>) attributes {dimension_semantics = [#tpu.dimension_semantics<arbitrary>], iteration_bounds = array<i64: 2>, scalar_prefetch = 0 : i64, scratch_operands = 1 : i64, tpu.core_type = #tpu.core_type<tc>, window_params = [{pipeline_mode = #tpu.pipeline_mode<synchronous>, transform_indices = @transform_0, window_bounds = array<i64: 16, 32>}, {pipeline_mode = #tpu.pipeline_mode<synchronous>, transform_indices = @transform_1, window_bounds = array<i64: 8, 32>}, {transform_indices = @transform_2, window_bounds = array<i64: 1, 1, 32>}, {transform_indices = @transform_3, window_bounds = array<i64: 1, 1, 32>}, {transform_indices = @transform_4, window_bounds = array<i64: 1, 32, 1536>}, {transform_indices = @transform_5, window_bounds = array<i64: 1, 512, 32>}, {transform_indices = @transform_6, window_bounds = array<i64: 1, 1, 32>}, {transform_indices = @transform_7, window_bounds = array<i64: 1, 1, 32>}, {transform_indices = @transform_8, window_bounds = array<i64: 1, 1, 32>}, {transform_indices = @transform_9, window_bounds = array<i64: 1, 32, 128>}, {transform_indices = @transform_10, window_bounds = array<i64: 1, 1, 128>}, {transform_indices = @transform_11, window_bounds = array<i64: 1, 128, 32>}, {transform_indices = @transform_12, window_bounds = array<i64: 1, 1, 32>}, {pipeline_mode = #tpu.pipeline_mode<synchronous>, transform_indices = @transform_13, window_bounds = array<i64: 1, 32>}, {pipeline_mode = #tpu.pipeline_mode<synchronous>, transform_indices = @transform_14, window_bounds = array<i64: 1, 32>}, {pipeline_mode = #tpu.pipeline_mode<synchronous>, transform_indices = @transform_15, window_bounds = array<i64: 16, 32>}]} {
    %c0_i32 = arith.constant 0 : i32
    %0 = arith.cmpi eq, %arg0, %c0_i32 : i32
    %1 = arith.extui %0 : i1 to i32
    %c0_i32_0 = arith.constant 0 : i32
    %2 = arith.cmpi ne, %1, %c0_i32_0 : i32
    scf.if %2 {
      %c0_95 = arith.constant 0 : index
      %c0_96 = arith.constant 0 : index
      %258 = vector.load %arg1[%c0_95, %c0_96] : memref<16x32xf32, #tpu.memory_space<vmem>>, vector<16x32xf32>
      %c0_97 = arith.constant 0 : index
      %c0_98 = arith.constant 0 : index
      %259 = vector.load %arg2[%c0_97, %c0_98] : memref<8x32xf32, #tpu.memory_space<vmem>>, vector<8x32xf32>
      %260 = tpu.concatenate %259, %259 in 0 : vector<8x32xf32>, vector<8x32xf32> -> vector<16x32xf32>
      %261 = arith.addf %258, %260 : vector<16x32xf32>
      %c0_99 = arith.constant 0 : index
      %c0_100 = arith.constant 0 : index
      %262 = vector.load %arg17[%c0_99, %c0_100] : memref<16x32xf32, #tpu.memory_space<vmem>>, vector<16x32xf32>
      tpu.vector_store %arg17[%c0_99, %c0_100], %261 {strides = array<i32>} : memref<16x32xf32, #tpu.memory_space<vmem>>, vector<16x32xf32>,
    } else {
    }
    %c0 = arith.constant 0 : index
    %c0_1 = arith.constant 0 : index
    %3 = vector.load %arg17[%c0, %c0_1] : memref<16x32xf32, #tpu.memory_space<vmem>>, vector<16x32xf32>
    %c0_2 = arith.constant 0 : index
    %c0_3 = arith.constant 0 : index
    %c0_4 = arith.constant 0 : index
    %4 = vector.load %arg3[%c0_2, %c0_3, %c0_4] : memref<1x1x32xf32, #tpu.memory_space<vmem>>, vector<1x1x32xf32>
    %5 = vector.shape_cast %4 : vector<1x1x32xf32> to vector<1x32xf32>
    %c0_5 = arith.constant 0 : index
    %c0_6 = arith.constant 0 : index
    %c0_7 = arith.constant 0 : index
    %6 = vector.load %arg4[%c0_5, %c0_6, %c0_7] : memref<1x1x32xf32, #tpu.memory_space<vmem>>, vector<1x1x32xf32>
    %7 = vector.shape_cast %6 : vector<1x1x32xf32> to vector<1x32xf32>
    %cst = arith.constant dense<0.000000e+00> : vector<16xf32>
    %8 = vector.multi_reduction <add>, %3, %cst [1] : vector<16x32xf32> to vector<16xf32>
    %9 = vector.shape_cast %8 : vector<16xf32> to vector<16x1xf32>
    %cst_8 = arith.constant 3.200000e+01 : f32
    %10 = vector.broadcast %cst_8 : f32 to vector<16x1xf32>
    %11 = arith.divf %9, %10 : vector<16x1xf32>
    %12 = vector.broadcast %11 : vector<16x1xf32> to vector<16x32xf32>
    %13 = arith.subf %3, %12 : vector<16x32xf32>
    %14 = arith.mulf %13, %13 : vector<16x32xf32>
    %cst_9 = arith.constant dense<0.000000e+00> : vector<16xf32>
    %15 = vector.multi_reduction <add>, %14, %cst_9 [1] : vector<16x32xf32> to vector<16xf32>
    %16 = vector.shape_cast %15 : vector<16xf32> to vector<16x1xf32>
    %cst_10 = arith.constant 3.200000e+01 : f32
    %17 = vector.broadcast %cst_10 : f32 to vector<16x1xf32>
    %18 = arith.divf %16, %17 : vector<16x1xf32>
    %19 = vector.broadcast %11 : vector<16x1xf32> to vector<16x32xf32>
    %20 = arith.subf %3, %19 : vector<16x32xf32>
    %cst_11 = arith.constant 9.99999974E-6 : f32
    %21 = vector.broadcast %cst_11 : f32 to vector<16x1xf32>
    %22 = arith.addf %18, %21 : vector<16x1xf32>
    %23 = math.rsqrt %22 : vector<16x1xf32>
    %24 = vector.broadcast %23 : vector<16x1xf32> to vector<16x32xf32>
    %25 = arith.mulf %20, %24 : vector<16x32xf32>
    %26 = vector.broadcast %5 : vector<1x32xf32> to vector<16x32xf32>
    %27 = arith.mulf %25, %26 : vector<16x32xf32>
    %28 = vector.broadcast %7 : vector<1x32xf32> to vector<16x32xf32>
    %29 = arith.addf %27, %28 : vector<16x32xf32>
    %30 = arith.truncf %29 : vector<16x32xf32> to vector<16x32xbf16>
    %c0_12 = arith.constant 0 : index
    %c0_13 = arith.constant 0 : index
    %c0_14 = arith.constant 0 : index
    %31 = vector.load %arg5[%c0_12, %c0_13, %c0_14] : memref<1x32x1536xbf16, #tpu.memory_space<vmem>>, vector<1x32x1536xbf16>
    %32 = vector.shape_cast %31 : vector<1x32x1536xbf16> to vector<32x1536xbf16>
    %cst_15 = arith.constant dense<0.000000e+00> : vector<16x1536xf32>
    %33 = tpu.matmul %30, %32, %cst_15 {dimension_numbers = #tpu.dot_dimension_numbers<[1], [0], [0], [1], [0, 0, 1, 1], [], []>} : vector<16x32xbf16>, vector<32x1536xbf16>, vector<16x1536xf32> -> vector<16x1536xf32>
    %34 = vector.extract_strided_slice %33 {offsets = [0, 0], sizes = [16, 512], strides = [1, 1]} : vector<16x1536xf32> to vector<16x512xf32>
    %35 = vector.shape_cast %34 : vector<16x512xf32> to vector<2x8x512xf32>
    %36 = arith.truncf %35 : vector<2x8x512xf32> to vector<2x8x512xbf16>
    %37 = vector.extract_strided_slice %33 {offsets = [0, 512], sizes = [16, 512], strides = [1, 1]} : vector<16x1536xf32> to vector<16x512xf32>
    %38 = vector.shape_cast %37 : vector<16x512xf32> to vector<2x8x512xf32>
    %39 = arith.truncf %38 : vector<2x8x512xf32> to vector<2x8x512xbf16>
    %40 = vector.extract_strided_slice %33 {offsets = [0, 1024], sizes = [16, 512], strides = [1, 1]} : vector<16x1536xf32> to vector<16x512xf32>
    %41 = vector.shape_cast %40 : vector<16x512xf32> to vector<2x8x512xf32>
    %42 = arith.truncf %41 : vector<2x8x512xf32> to vector<2x8x512xbf16>
    %43 = vector.extract_strided_slice %36 {offsets = [0, 0, 0], sizes = [2, 8, 64], strides = [1, 1, 1]} : vector<2x8x512xbf16> to vector<2x8x64xbf16>
    %44 = vector.extract_strided_slice %39 {offsets = [0, 0, 0], sizes = [2, 8, 64], strides = [1, 1, 1]} : vector<2x8x512xbf16> to vector<2x8x64xbf16>
    %45 = vector.extract_strided_slice %42 {offsets = [0, 0, 0], sizes = [2, 8, 64], strides = [1, 1, 1]} : vector<2x8x512xbf16> to vector<2x8x64xbf16>
    "tpu.trace_start"() <{level = 10 : i32, message = "bqd,bkd->bqk"}> : () -> ()
    %cst_16 = arith.constant dense<0.000000e+00> : vector<2x8x8xf32>
    %46 = tpu.matmul %43, %44, %cst_16 {dimension_numbers = #tpu.dot_dimension_numbers<[2], [2], [1], [1], [0, 0, 0, 1, 1, 1], [0], [0]>} : vector<2x8x64xbf16>, vector<2x8x64xbf16>, vector<2x8x8xf32> -> vector<2x8x8xf32>
    "tpu.trace_stop"() : () -> ()
    %cst_17 = arith.constant 1.250000e-01 : f32
    %47 = vector.broadcast %cst_17 : f32 to vector<2x8x8xf32>
    %48 = arith.mulf %46, %47 : vector<2x8x8xf32>
    %cst_18 = arith.constant dense<0xFF800000> : vector<2x8xf32>
    %49 = vector.multi_reduction <maximumf>, %48, %cst_18 [2] : vector<2x8x8xf32> to vector<2x8xf32>
    %50 = vector.shape_cast %49 : vector<2x8xf32> to vector<2x8x1xf32>
    %51 = vector.broadcast %50 : vector<2x8x1xf32> to vector<2x8x8xf32>
    %52 = arith.subf %48, %51 : vector<2x8x8xf32>
    %53 = math.exp %52 : vector<2x8x8xf32>
    %cst_19 = arith.constant dense<0.000000e+00> : vector<2x8xf32>
    %54 = vector.multi_reduction <add>, %53, %cst_19 [2] : vector<2x8x8xf32> to vector<2x8xf32>
    %55 = vector.shape_cast %54 : vector<2x8xf32> to vector<2x8x1xf32>
    %56 = tpu.reciprocal %55 {approx = true} : vector<2x8x1xf32> -> vector<2x8x1xf32>
    %57 = vector.broadcast %56 : vector<2x8x1xf32> to vector<2x8x8xf32>
    %58 = arith.mulf %53, %57 : vector<2x8x8xf32>
    %59 = arith.truncf %58 : vector<2x8x8xf32> to vector<2x8x8xbf16>
    "tpu.trace_start"() <{level = 10 : i32, message = "bqk,bkd->bqd"}> : () -> ()
    %cst_20 = arith.constant dense<0.000000e+00> : vector<2x8x64xf32>
    %60 = tpu.matmul %59, %45, %cst_20 {dimension_numbers = #tpu.dot_dimension_numbers<[2], [1], [1], [2], [0, 0, 0, 1, 1, 2], [0], [0]>} : vector<2x8x8xbf16>, vector<2x8x64xbf16>, vector<2x8x64xf32> -> vector<2x8x64xf32>
    "tpu.trace_stop"() : () -> ()
    %61 = vector.extract_strided_slice %36 {offsets = [0, 0, 64], sizes = [2, 8, 64], strides = [1, 1, 1]} : vector<2x8x512xbf16> to vector<2x8x64xbf16>
    %62 = vector.extract_strided_slice %39 {offsets = [0, 0, 64], sizes = [2, 8, 64], strides = [1, 1, 1]} : vector<2x8x512xbf16> to vector<2x8x64xbf16>
    %63 = vector.extract_strided_slice %42 {offsets = [0, 0, 64], sizes = [2, 8, 64], strides = [1, 1, 1]} : vector<2x8x512xbf16> to vector<2x8x64xbf16>
    "tpu.trace_start"() <{level = 10 : i32, message = "bqd,bkd->bqk"}> : () -> ()
    %cst_21 = arith.constant dense<0.000000e+00> : vector<2x8x8xf32>
    %64 = tpu.matmul %61, %62, %cst_21 {dimension_numbers = #tpu.dot_dimension_numbers<[2], [2], [1], [1], [0, 0, 0, 1, 1, 1], [0], [0]>} : vector<2x8x64xbf16>, vector<2x8x64xbf16>, vector<2x8x8xf32> -> vector<2x8x8xf32>
    "tpu.trace_stop"() : () -> ()
    %cst_22 = arith.constant 1.250000e-01 : f32
    %65 = vector.broadcast %cst_22 : f32 to vector<2x8x8xf32>
    %66 = arith.mulf %64, %65 : vector<2x8x8xf32>
    %cst_23 = arith.constant dense<0xFF800000> : vector<2x8xf32>
    %67 = vector.multi_reduction <maximumf>, %66, %cst_23 [2] : vector<2x8x8xf32> to vector<2x8xf32>
    %68 = vector.shape_cast %67 : vector<2x8xf32> to vector<2x8x1xf32>
    %69 = vector.broadcast %68 : vector<2x8x1xf32> to vector<2x8x8xf32>
    %70 = arith.subf %66, %69 : vector<2x8x8xf32>
    %71 = math.exp %70 : vector<2x8x8xf32>
    %cst_24 = arith.constant dense<0.000000e+00> : vector<2x8xf32>
    %72 = vector.multi_reduction <add>, %71, %cst_24 [2] : vector<2x8x8xf32> to vector<2x8xf32>
    %73 = vector.shape_cast %72 : vector<2x8xf32> to vector<2x8x1xf32>
    %74 = tpu.reciprocal %73 {approx = true} : vector<2x8x1xf32> -> vector<2x8x1xf32>
    %75 = vector.broadcast %74 : vector<2x8x1xf32> to vector<2x8x8xf32>
    %76 = arith.mulf %71, %75 : vector<2x8x8xf32>
    %77 = arith.truncf %76 : vector<2x8x8xf32> to vector<2x8x8xbf16>
    "tpu.trace_start"() <{level = 10 : i32, message = "bqk,bkd->bqd"}> : () -> ()
    %cst_25 = arith.constant dense<0.000000e+00> : vector<2x8x64xf32>
    %78 = tpu.matmul %77, %63, %cst_25 {dimension_numbers = #tpu.dot_dimension_numbers<[2], [1], [1], [2], [0, 0, 0, 1, 1, 2], [0], [0]>} : vector<2x8x8xbf16>, vector<2x8x64xbf16>, vector<2x8x64xf32> -> vector<2x8x64xf32>
    "tpu.trace_stop"() : () -> ()
    %79 = vector.extract_strided_slice %36 {offsets = [0, 0, 128], sizes = [2, 8, 64], strides = [1, 1, 1]} : vector<2x8x512xbf16> to vector<2x8x64xbf16>
    %80 = vector.extract_strided_slice %39 {offsets = [0, 0, 128], sizes = [2, 8, 64], strides = [1, 1, 1]} : vector<2x8x512xbf16> to vector<2x8x64xbf16>
    %81 = vector.extract_strided_slice %42 {offsets = [0, 0, 128], sizes = [2, 8, 64], strides = [1, 1, 1]} : vector<2x8x512xbf16> to vector<2x8x64xbf16>
    "tpu.trace_start"() <{level = 10 : i32, message = "bqd,bkd->bqk"}> : () -> ()
    %cst_26 = arith.constant dense<0.000000e+00> : vector<2x8x8xf32>
    %82 = tpu.matmul %79, %80, %cst_26 {dimension_numbers = #tpu.dot_dimension_numbers<[2], [2], [1], [1], [0, 0, 0, 1, 1, 1], [0], [0]>} : vector<2x8x64xbf16>, vector<2x8x64xbf16>, vector<2x8x8xf32> -> vector<2x8x8xf32>
    "tpu.trace_stop"() : () -> ()
    %cst_27 = arith.constant 1.250000e-01 : f32
    %83 = vector.broadcast %cst_27 : f32 to vector<2x8x8xf32>
    %84 = arith.mulf %82, %83 : vector<2x8x8xf32>
    %cst_28 = arith.constant dense<0xFF800000> : vector<2x8xf32>
    %85 = vector.multi_reduction <maximumf>, %84, %cst_28 [2] : vector<2x8x8xf32> to vector<2x8xf32>
    %86 = vector.shape_cast %85 : vector<2x8xf32> to vector<2x8x1xf32>
    %87 = vector.broadcast %86 : vector<2x8x1xf32> to vector<2x8x8xf32>
    %88 = arith.subf %84, %87 : vector<2x8x8xf32>
    %89 = math.exp %88 : vector<2x8x8xf32>
    %cst_29 = arith.constant dense<0.000000e+00> : vector<2x8xf32>
    %90 = vector.multi_reduction <add>, %89, %cst_29 [2] : vector<2x8x8xf32> to vector<2x8xf32>
    %91 = vector.shape_cast %90 : vector<2x8xf32> to vector<2x8x1xf32>
    %92 = tpu.reciprocal %91 {approx = true} : vector<2x8x1xf32> -> vector<2x8x1xf32>
    %93 = vector.broadcast %92 : vector<2x8x1xf32> to vector<2x8x8xf32>
    %94 = arith.mulf %89, %93 : vector<2x8x8xf32>
    %95 = arith.truncf %94 : vector<2x8x8xf32> to vector<2x8x8xbf16>
    "tpu.trace_start"() <{level = 10 : i32, message = "bqk,bkd->bqd"}> : () -> ()
    %cst_30 = arith.constant dense<0.000000e+00> : vector<2x8x64xf32>
    %96 = tpu.matmul %95, %81, %cst_30 {dimension_numbers = #tpu.dot_dimension_numbers<[2], [1], [1], [2], [0, 0, 0, 1, 1, 2], [0], [0]>} : vector<2x8x8xbf16>, vector<2x8x64xbf16>, vector<2x8x64xf32> -> vector<2x8x64xf32>
    "tpu.trace_stop"() : () -> ()
    %97 = vector.extract_strided_slice %36 {offsets = [0, 0, 192], sizes = [2, 8, 64], strides = [1, 1, 1]} : vector<2x8x512xbf16> to vector<2x8x64xbf16>
    %98 = vector.extract_strided_slice %39 {offsets = [0, 0, 192], sizes = [2, 8, 64], strides = [1, 1, 1]} : vector<2x8x512xbf16> to vector<2x8x64xbf16>
    %99 = vector.extract_strided_slice %42 {offsets = [0, 0, 192], sizes = [2, 8, 64], strides = [1, 1, 1]} : vector<2x8x512xbf16> to vector<2x8x64xbf16>
    "tpu.trace_start"() <{level = 10 : i32, message = "bqd,bkd->bqk"}> : () -> ()
    %cst_31 = arith.constant dense<0.000000e+00> : vector<2x8x8xf32>
    %100 = tpu.matmul %97, %98, %cst_31 {dimension_numbers = #tpu.dot_dimension_numbers<[2], [2], [1], [1], [0, 0, 0, 1, 1, 1], [0], [0]>} : vector<2x8x64xbf16>, vector<2x8x64xbf16>, vector<2x8x8xf32> -> vector<2x8x8xf32>
    "tpu.trace_stop"() : () -> ()
    %cst_32 = arith.constant 1.250000e-01 : f32
    %101 = vector.broadcast %cst_32 : f32 to vector<2x8x8xf32>
    %102 = arith.mulf %100, %101 : vector<2x8x8xf32>
    %cst_33 = arith.constant dense<0xFF800000> : vector<2x8xf32>
    %103 = vector.multi_reduction <maximumf>, %102, %cst_33 [2] : vector<2x8x8xf32> to vector<2x8xf32>
    %104 = vector.shape_cast %103 : vector<2x8xf32> to vector<2x8x1xf32>
    %105 = vector.broadcast %104 : vector<2x8x1xf32> to vector<2x8x8xf32>
    %106 = arith.subf %102, %105 : vector<2x8x8xf32>
    %107 = math.exp %106 : vector<2x8x8xf32>
    %cst_34 = arith.constant dense<0.000000e+00> : vector<2x8xf32>
    %108 = vector.multi_reduction <add>, %107, %cst_34 [2] : vector<2x8x8xf32> to vector<2x8xf32>
    %109 = vector.shape_cast %108 : vector<2x8xf32> to vector<2x8x1xf32>
    %110 = tpu.reciprocal %109 {approx = true} : vector<2x8x1xf32> -> vector<2x8x1xf32>
    %111 = vector.broadcast %110 : vector<2x8x1xf32> to vector<2x8x8xf32>
    %112 = arith.mulf %107, %111 : vector<2x8x8xf32>
    %113 = arith.truncf %112 : vector<2x8x8xf32> to vector<2x8x8xbf16>
    "tpu.trace_start"() <{level = 10 : i32, message = "bqk,bkd->bqd"}> : () -> ()
    %cst_35 = arith.constant dense<0.000000e+00> : vector<2x8x64xf32>
    %114 = tpu.matmul %113, %99, %cst_35 {dimension_numbers = #tpu.dot_dimension_numbers<[2], [1], [1], [2], [0, 0, 0, 1, 1, 2], [0], [0]>} : vector<2x8x8xbf16>, vector<2x8x64xbf16>, vector<2x8x64xf32> -> vector<2x8x64xf32>
    "tpu.trace_stop"() : () -> ()
    %115 = vector.extract_strided_slice %36 {offsets = [0, 0, 256], sizes = [2, 8, 64], strides = [1, 1, 1]} : vector<2x8x512xbf16> to vector<2x8x64xbf16>
    %116 = vector.extract_strided_slice %39 {offsets = [0, 0, 256], sizes = [2, 8, 64], strides = [1, 1, 1]} : vector<2x8x512xbf16> to vector<2x8x64xbf16>
    %117 = vector.extract_strided_slice %42 {offsets = [0, 0, 256], sizes = [2, 8, 64], strides = [1, 1, 1]} : vector<2x8x512xbf16> to vector<2x8x64xbf16>
    "tpu.trace_start"() <{level = 10 : i32, message = "bqd,bkd->bqk"}> : () -> ()
    %cst_36 = arith.constant dense<0.000000e+00> : vector<2x8x8xf32>
    %118 = tpu.matmul %115, %116, %cst_36 {dimension_numbers = #tpu.dot_dimension_numbers<[2], [2], [1], [1], [0, 0, 0, 1, 1, 1], [0], [0]>} : vector<2x8x64xbf16>, vector<2x8x64xbf16>, vector<2x8x8xf32> -> vector<2x8x8xf32>
    "tpu.trace_stop"() : () -> ()
    %cst_37 = arith.constant 1.250000e-01 : f32
    %119 = vector.broadcast %cst_37 : f32 to vector<2x8x8xf32>
    %120 = arith.mulf %118, %119 : vector<2x8x8xf32>
    %cst_38 = arith.constant dense<0xFF800000> : vector<2x8xf32>
    %121 = vector.multi_reduction <maximumf>, %120, %cst_38 [2] : vector<2x8x8xf32> to vector<2x8xf32>
    %122 = vector.shape_cast %121 : vector<2x8xf32> to vector<2x8x1xf32>
    %123 = vector.broadcast %122 : vector<2x8x1xf32> to vector<2x8x8xf32>
    %124 = arith.subf %120, %123 : vector<2x8x8xf32>
    %125 = math.exp %124 : vector<2x8x8xf32>
    %cst_39 = arith.constant dense<0.000000e+00> : vector<2x8xf32>
    %126 = vector.multi_reduction <add>, %125, %cst_39 [2] : vector<2x8x8xf32> to vector<2x8xf32>
    %127 = vector.shape_cast %126 : vector<2x8xf32> to vector<2x8x1xf32>
    %128 = tpu.reciprocal %127 {approx = true} : vector<2x8x1xf32> -> vector<2x8x1xf32>
    %129 = vector.broadcast %128 : vector<2x8x1xf32> to vector<2x8x8xf32>
    %130 = arith.mulf %125, %129 : vector<2x8x8xf32>
    %131 = arith.truncf %130 : vector<2x8x8xf32> to vector<2x8x8xbf16>
    "tpu.trace_start"() <{level = 10 : i32, message = "bqk,bkd->bqd"}> : () -> ()
    %cst_40 = arith.constant dense<0.000000e+00> : vector<2x8x64xf32>
    %132 = tpu.matmul %131, %117, %cst_40 {dimension_numbers = #tpu.dot_dimension_numbers<[2], [1], [1], [2], [0, 0, 0, 1, 1, 2], [0], [0]>} : vector<2x8x8xbf16>, vector<2x8x64xbf16>, vector<2x8x64xf32> -> vector<2x8x64xf32>
    "tpu.trace_stop"() : () -> ()
    %133 = vector.extract_strided_slice %36 {offsets = [0, 0, 320], sizes = [2, 8, 64], strides = [1, 1, 1]} : vector<2x8x512xbf16> to vector<2x8x64xbf16>
    %134 = vector.extract_strided_slice %39 {offsets = [0, 0, 320], sizes = [2, 8, 64], strides = [1, 1, 1]} : vector<2x8x512xbf16> to vector<2x8x64xbf16>
    %135 = vector.extract_strided_slice %42 {offsets = [0, 0, 320], sizes = [2, 8, 64], strides = [1, 1, 1]} : vector<2x8x512xbf16> to vector<2x8x64xbf16>
    "tpu.trace_start"() <{level = 10 : i32, message = "bqd,bkd->bqk"}> : () -> ()
    %cst_41 = arith.constant dense<0.000000e+00> : vector<2x8x8xf32>
    %136 = tpu.matmul %133, %134, %cst_41 {dimension_numbers = #tpu.dot_dimension_numbers<[2], [2], [1], [1], [0, 0, 0, 1, 1, 1], [0], [0]>} : vector<2x8x64xbf16>, vector<2x8x64xbf16>, vector<2x8x8xf32> -> vector<2x8x8xf32>
    "tpu.trace_stop"() : () -> ()
    %cst_42 = arith.constant 1.250000e-01 : f32
    %137 = vector.broadcast %cst_42 : f32 to vector<2x8x8xf32>
    %138 = arith.mulf %136, %137 : vector<2x8x8xf32>
    %cst_43 = arith.constant dense<0xFF800000> : vector<2x8xf32>
    %139 = vector.multi_reduction <maximumf>, %138, %cst_43 [2] : vector<2x8x8xf32> to vector<2x8xf32>
    %140 = vector.shape_cast %139 : vector<2x8xf32> to vector<2x8x1xf32>
    %141 = vector.broadcast %140 : vector<2x8x1xf32> to vector<2x8x8xf32>
    %142 = arith.subf %138, %141 : vector<2x8x8xf32>
    %143 = math.exp %142 : vector<2x8x8xf32>
    %cst_44 = arith.constant dense<0.000000e+00> : vector<2x8xf32>
    %144 = vector.multi_reduction <add>, %143, %cst_44 [2] : vector<2x8x8xf32> to vector<2x8xf32>
    %145 = vector.shape_cast %144 : vector<2x8xf32> to vector<2x8x1xf32>
    %146 = tpu.reciprocal %145 {approx = true} : vector<2x8x1xf32> -> vector<2x8x1xf32>
    %147 = vector.broadcast %146 : vector<2x8x1xf32> to vector<2x8x8xf32>
    %148 = arith.mulf %143, %147 : vector<2x8x8xf32>
    %149 = arith.truncf %148 : vector<2x8x8xf32> to vector<2x8x8xbf16>
    "tpu.trace_start"() <{level = 10 : i32, message = "bqk,bkd->bqd"}> : () -> ()
    %cst_45 = arith.constant dense<0.000000e+00> : vector<2x8x64xf32>
    %150 = tpu.matmul %149, %135, %cst_45 {dimension_numbers = #tpu.dot_dimension_numbers<[2], [1], [1], [2], [0, 0, 0, 1, 1, 2], [0], [0]>} : vector<2x8x8xbf16>, vector<2x8x64xbf16>, vector<2x8x64xf32> -> vector<2x8x64xf32>
    "tpu.trace_stop"() : () -> ()
    %151 = vector.extract_strided_slice %36 {offsets = [0, 0, 384], sizes = [2, 8, 64], strides = [1, 1, 1]} : vector<2x8x512xbf16> to vector<2x8x64xbf16>
    %152 = vector.extract_strided_slice %39 {offsets = [0, 0, 384], sizes = [2, 8, 64], strides = [1, 1, 1]} : vector<2x8x512xbf16> to vector<2x8x64xbf16>
    %153 = vector.extract_strided_slice %42 {offsets = [0, 0, 384], sizes = [2, 8, 64], strides = [1, 1, 1]} : vector<2x8x512xbf16> to vector<2x8x64xbf16>
    "tpu.trace_start"() <{level = 10 : i32, message = "bqd,bkd->bqk"}> : () -> ()
    %cst_46 = arith.constant dense<0.000000e+00> : vector<2x8x8xf32>
    %154 = tpu.matmul %151, %152, %cst_46 {dimension_numbers = #tpu.dot_dimension_numbers<[2], [2], [1], [1], [0, 0, 0, 1, 1, 1], [0], [0]>} : vector<2x8x64xbf16>, vector<2x8x64xbf16>, vector<2x8x8xf32> -> vector<2x8x8xf32>
    "tpu.trace_stop"() : () -> ()
    %cst_47 = arith.constant 1.250000e-01 : f32
    %155 = vector.broadcast %cst_47 : f32 to vector<2x8x8xf32>
    %156 = arith.mulf %154, %155 : vector<2x8x8xf32>
    %cst_48 = arith.constant dense<0xFF800000> : vector<2x8xf32>
    %157 = vector.multi_reduction <maximumf>, %156, %cst_48 [2] : vector<2x8x8xf32> to vector<2x8xf32>
    %158 = vector.shape_cast %157 : vector<2x8xf32> to vector<2x8x1xf32>
    %159 = vector.broadcast %158 : vector<2x8x1xf32> to vector<2x8x8xf32>
    %160 = arith.subf %156, %159 : vector<2x8x8xf32>
    %161 = math.exp %160 : vector<2x8x8xf32>
    %cst_49 = arith.constant dense<0.000000e+00> : vector<2x8xf32>
    %162 = vector.multi_reduction <add>, %161, %cst_49 [2] : vector<2x8x8xf32> to vector<2x8xf32>
    %163 = vector.shape_cast %162 : vector<2x8xf32> to vector<2x8x1xf32>
    %164 = tpu.reciprocal %163 {approx = true} : vector<2x8x1xf32> -> vector<2x8x1xf32>
    %165 = vector.broadcast %164 : vector<2x8x1xf32> to vector<2x8x8xf32>
    %166 = arith.mulf %161, %165 : vector<2x8x8xf32>
    %167 = arith.truncf %166 : vector<2x8x8xf32> to vector<2x8x8xbf16>
    "tpu.trace_start"() <{level = 10 : i32, message = "bqk,bkd->bqd"}> : () -> ()
    %cst_50 = arith.constant dense<0.000000e+00> : vector<2x8x64xf32>
    %168 = tpu.matmul %167, %153, %cst_50 {dimension_numbers = #tpu.dot_dimension_numbers<[2], [1], [1], [2], [0, 0, 0, 1, 1, 2], [0], [0]>} : vector<2x8x8xbf16>, vector<2x8x64xbf16>, vector<2x8x64xf32> -> vector<2x8x64xf32>
    "tpu.trace_stop"() : () -> ()
    %169 = vector.extract_strided_slice %36 {offsets = [0, 0, 448], sizes = [2, 8, 64], strides = [1, 1, 1]} : vector<2x8x512xbf16> to vector<2x8x64xbf16>
    %170 = vector.extract_strided_slice %39 {offsets = [0, 0, 448], sizes = [2, 8, 64], strides = [1, 1, 1]} : vector<2x8x512xbf16> to vector<2x8x64xbf16>
    %171 = vector.extract_strided_slice %42 {offsets = [0, 0, 448], sizes = [2, 8, 64], strides = [1, 1, 1]} : vector<2x8x512xbf16> to vector<2x8x64xbf16>
    "tpu.trace_start"() <{level = 10 : i32, message = "bqd,bkd->bqk"}> : () -> ()
    %cst_51 = arith.constant dense<0.000000e+00> : vector<2x8x8xf32>
    %172 = tpu.matmul %169, %170, %cst_51 {dimension_numbers = #tpu.dot_dimension_numbers<[2], [2], [1], [1], [0, 0, 0, 1, 1, 1], [0], [0]>} : vector<2x8x64xbf16>, vector<2x8x64xbf16>, vector<2x8x8xf32> -> vector<2x8x8xf32>
    "tpu.trace_stop"() : () -> ()
    %cst_52 = arith.constant 1.250000e-01 : f32
    %173 = vector.broadcast %cst_52 : f32 to vector<2x8x8xf32>
    %174 = arith.mulf %172, %173 : vector<2x8x8xf32>
    %cst_53 = arith.constant dense<0xFF800000> : vector<2x8xf32>
    %175 = vector.multi_reduction <maximumf>, %174, %cst_53 [2] : vector<2x8x8xf32> to vector<2x8xf32>
    %176 = vector.shape_cast %175 : vector<2x8xf32> to vector<2x8x1xf32>
    %177 = vector.broadcast %176 : vector<2x8x1xf32> to vector<2x8x8xf32>
    %178 = arith.subf %174, %177 : vector<2x8x8xf32>
    %179 = math.exp %178 : vector<2x8x8xf32>
    %cst_54 = arith.constant dense<0.000000e+00> : vector<2x8xf32>
    %180 = vector.multi_reduction <add>, %179, %cst_54 [2] : vector<2x8x8xf32> to vector<2x8xf32>
    %181 = vector.shape_cast %180 : vector<2x8xf32> to vector<2x8x1xf32>
    %182 = tpu.reciprocal %181 {approx = true} : vector<2x8x1xf32> -> vector<2x8x1xf32>
    %183 = vector.broadcast %182 : vector<2x8x1xf32> to vector<2x8x8xf32>
    %184 = arith.mulf %179, %183 : vector<2x8x8xf32>
    %185 = arith.truncf %184 : vector<2x8x8xf32> to vector<2x8x8xbf16>
    "tpu.trace_start"() <{level = 10 : i32, message = "bqk,bkd->bqd"}> : () -> ()
    %cst_55 = arith.constant dense<0.000000e+00> : vector<2x8x64xf32>
    %186 = tpu.matmul %185, %171, %cst_55 {dimension_numbers = #tpu.dot_dimension_numbers<[2], [1], [1], [2], [0, 0, 0, 1, 1, 2], [0], [0]>} : vector<2x8x8xbf16>, vector<2x8x64xbf16>, vector<2x8x64xf32> -> vector<2x8x64xf32>
    "tpu.trace_stop"() : () -> ()
    %187 = tpu.concatenate %60, %78, %96, %114, %132, %150, %168, %186 in 2 : vector<2x8x64xf32>, vector<2x8x64xf32>, vector<2x8x64xf32>, vector<2x8x64xf32>, vector<2x8x64xf32>, vector<2x8x64xf32>, vector<2x8x64xf32>, vector<2x8x64xf32> -> vector<2x8x512xf32>
    %188 = vector.shape_cast %187 : vector<2x8x512xf32> to vector<16x512xf32>
    %189 = arith.truncf %188 : vector<16x512xf32> to vector<16x512xbf16>
    %c0_56 = arith.constant 0 : index
    %c0_57 = arith.constant 0 : index
    %c0_58 = arith.constant 0 : index
    %190 = vector.load %arg6[%c0_56, %c0_57, %c0_58] : memref<1x512x32xbf16, #tpu.memory_space<vmem>>, vector<1x512x32xbf16>
    %191 = vector.shape_cast %190 : vector<1x512x32xbf16> to vector<512x32xbf16>
    %cst_59 = arith.constant dense<0.000000e+00> : vector<16x32xf32>
    %192 = tpu.matmul %189, %191, %cst_59 {dimension_numbers = #tpu.dot_dimension_numbers<[1], [0], [0], [1], [0, 0, 1, 1], [], []>} : vector<16x512xbf16>, vector<512x32xbf16>, vector<16x32xf32> -> vector<16x32xf32>
    %c0_60 = arith.constant 0 : index
    %c0_61 = arith.constant 0 : index
    %c0_62 = arith.constant 0 : index
    %193 = vector.load %arg7[%c0_60, %c0_61, %c0_62] : memref<1x1x32xf32, #tpu.memory_space<vmem>>, vector<1x1x32xf32>
    %194 = vector.shape_cast %193 : vector<1x1x32xf32> to vector<1x32xf32>
    %195 = vector.broadcast %194 : vector<1x32xf32> to vector<16x32xf32>
    %196 = arith.addf %192, %195 : vector<16x32xf32>
    %197 = arith.addf %3, %196 : vector<16x32xf32>
    %c0_63 = arith.constant 0 : index
    %c0_64 = arith.constant 0 : index
    %c0_65 = arith.constant 0 : index
    %198 = vector.load %arg8[%c0_63, %c0_64, %c0_65] : memref<1x1x32xf32, #tpu.memory_space<vmem>>, vector<1x1x32xf32>
    %199 = vector.shape_cast %198 : vector<1x1x32xf32> to vector<1x32xf32>
    %c0_66 = arith.constant 0 : index
    %c0_67 = arith.constant 0 : index
    %c0_68 = arith.constant 0 : index
    %200 = vector.load %arg9[%c0_66, %c0_67, %c0_68] : memref<1x1x32xf32, #tpu.memory_space<vmem>>, vector<1x1x32xf32>
    %201 = vector.shape_cast %200 : vector<1x1x32xf32> to vector<1x32xf32>
    %cst_69 = arith.constant dense<0.000000e+00> : vector<16xf32>
    %202 = vector.multi_reduction <add>, %197, %cst_69 [1] : vector<16x32xf32> to vector<16xf32>
    %203 = vector.shape_cast %202 : vector<16xf32> to vector<16x1xf32>
    %cst_70 = arith.constant 3.200000e+01 : f32
    %204 = vector.broadcast %cst_70 : f32 to vector<16x1xf32>
    %205 = arith.divf %203, %204 : vector<16x1xf32>
    %206 = vector.broadcast %205 : vector<16x1xf32> to vector<16x32xf32>
    %207 = arith.subf %197, %206 : vector<16x32xf32>
    %208 = arith.mulf %207, %207 : vector<16x32xf32>
    %cst_71 = arith.constant dense<0.000000e+00> : vector<16xf32>
    %209 = vector.multi_reduction <add>, %208, %cst_71 [1] : vector<16x32xf32> to vector<16xf32>
    %210 = vector.shape_cast %209 : vector<16xf32> to vector<16x1xf32>
    %cst_72 = arith.constant 3.200000e+01 : f32
    %211 = vector.broadcast %cst_72 : f32 to vector<16x1xf32>
    %212 = arith.divf %210, %211 : vector<16x1xf32>
    %213 = vector.broadcast %205 : vector<16x1xf32> to vector<16x32xf32>
    %214 = arith.subf %197, %213 : vector<16x32xf32>
    %cst_73 = arith.constant 9.99999974E-6 : f32
    %215 = vector.broadcast %cst_73 : f32 to vector<16x1xf32>
    %216 = arith.addf %212, %215 : vector<16x1xf32>
    %217 = math.rsqrt %216 : vector<16x1xf32>
    %218 = vector.broadcast %217 : vector<16x1xf32> to vector<16x32xf32>
    %219 = arith.mulf %214, %218 : vector<16x32xf32>
    %220 = vector.broadcast %199 : vector<1x32xf32> to vector<16x32xf32>
    %221 = arith.mulf %219, %220 : vector<16x32xf32>
    %222 = vector.broadcast %201 : vector<1x32xf32> to vector<16x32xf32>
    %223 = arith.addf %221, %222 : vector<16x32xf32>
    %224 = arith.truncf %223 : vector<16x32xf32> to vector<16x32xbf16>
    %c0_74 = arith.constant 0 : index
    %c0_75 = arith.constant 0 : index
    %c0_76 = arith.constant 0 : index
    %225 = vector.load %arg10[%c0_74, %c0_75, %c0_76] : memref<1x32x128xbf16, #tpu.memory_space<vmem>>, vector<1x32x128xbf16>
    %226 = vector.shape_cast %225 : vector<1x32x128xbf16> to vector<32x128xbf16>
    %cst_77 = arith.constant dense<0.000000e+00> : vector<16x128xf32>
    %227 = tpu.matmul %224, %226, %cst_77 {dimension_numbers = #tpu.dot_dimension_numbers<[1], [0], [0], [1], [0, 0, 1, 1], [], []>} : vector<16x32xbf16>, vector<32x128xbf16>, vector<16x128xf32> -> vector<16x128xf32>
    %c0_78 = arith.constant 0 : index
    %c0_79 = arith.constant 0 : index
    %c0_80 = arith.constant 0 : index
    %228 = vector.load %arg11[%c0_78, %c0_79, %c0_80] : memref<1x1x128xf32, #tpu.memory_space<vmem>>, vector<1x1x128xf32>
    %229 = vector.shape_cast %228 : vector<1x1x128xf32> to vector<1x128xf32>
    %230 = vector.broadcast %229 : vector<1x128xf32> to vector<16x128xf32>
    %231 = arith.addf %227, %230 : vector<16x128xf32>
    %232 = arith.mulf %231, %231 : vector<16x128xf32>
    %233 = arith.mulf %231, %232 : vector<16x128xf32>
    %cst_81 = arith.constant 4.471500e-02 : f32
    %234 = vector.broadcast %cst_81 : f32 to vector<16x128xf32>
    %235 = arith.mulf %234, %233 : vector<16x128xf32>
    %236 = arith.addf %231, %235 : vector<16x128xf32>
    %cst_82 = arith.constant 0.797884583 : f32
    %237 = vector.broadcast %cst_82 : f32 to vector<16x128xf32>
    %238 = arith.mulf %237, %236 : vector<16x128xf32>
    %239 = math.tanh %238 : vector<16x128xf32>
    %cst_83 = arith.constant 1.000000e+00 : f32
    %240 = vector.broadcast %cst_83 : f32 to vector<16x128xf32>
    %241 = arith.addf %240, %239 : vector<16x128xf32>
    %cst_84 = arith.constant 5.000000e-01 : f32
    %242 = vector.broadcast %cst_84 : f32 to vector<16x128xf32>
    %243 = arith.mulf %242, %241 : vector<16x128xf32>
    %244 = arith.mulf %231, %243 : vector<16x128xf32>
    %245 = arith.truncf %244 : vector<16x128xf32> to vector<16x128xbf16>
    %c0_85 = arith.constant 0 : index
    %c0_86 = arith.constant 0 : index
    %c0_87 = arith.constant 0 : index
    %246 = vector.load %arg12[%c0_85, %c0_86, %c0_87] : memref<1x128x32xbf16, #tpu.memory_space<vmem>>, vector<1x128x32xbf16>
    %247 = vector.shape_cast %246 : vector<1x128x32xbf16> to vector<128x32xbf16>
    %cst_88 = arith.constant dense<0.000000e+00> : vector<16x32xf32>
    %248 = tpu.matmul %245, %247, %cst_88 {dimension_numbers = #tpu.dot_dimension_numbers<[1], [0], [0], [1], [0, 0, 1, 1], [], []>} : vector<16x128xbf16>, vector<128x32xbf16>, vector<16x32xf32> -> vector<16x32xf32>
    %c0_89 = arith.constant 0 : index
    %c0_90 = arith.constant 0 : index
    %c0_91 = arith.constant 0 : index
    %249 = vector.load %arg13[%c0_89, %c0_90, %c0_91] : memref<1x1x32xf32, #tpu.memory_space<vmem>>, vector<1x1x32xf32>
    %250 = vector.shape_cast %249 : vector<1x1x32xf32> to vector<1x32xf32>
    %251 = vector.broadcast %250 : vector<1x32xf32> to vector<16x32xf32>
    %252 = arith.addf %248, %251 : vector<16x32xf32>
    %253 = arith.addf %197, %252 : vector<16x32xf32>
    %c0_92 = arith.constant 0 : index
    %c0_93 = arith.constant 0 : index
    %254 = vector.load %arg17[%c0_92, %c0_93] : memref<16x32xf32, #tpu.memory_space<vmem>>, vector<16x32xf32>
    tpu.vector_store %arg17[%c0_92, %c0_93], %253 {strides = array<i32>} : memref<16x32xf32, #tpu.memory_space<vmem>>, vector<16x32xf32>,
    %c1_i32 = arith.constant 1 : i32
    %255 = arith.cmpi eq, %arg0, %c1_i32 : i32
    %256 = arith.extui %255 : i1 to i32
    %c0_i32_94 = arith.constant 0 : i32
    %257 = arith.cmpi ne, %256, %c0_i32_94 : i32
    scf.if %257 {
      %c0_95 = arith.constant 0 : index
      %c0_96 = arith.constant 0 : index
      %258 = vector.load %arg14[%c0_95, %c0_96] : memref<1x32xf32, #tpu.memory_space<vmem>>, vector<1x32xf32>
      %c0_97 = arith.constant 0 : index
      %c0_98 = arith.constant 0 : index
      %259 = vector.load %arg15[%c0_97, %c0_98] : memref<1x32xf32, #tpu.memory_space<vmem>>, vector<1x32xf32>
      %cst_99 = arith.constant dense<0.000000e+00> : vector<16xf32>
      %260 = vector.multi_reduction <add>, %253, %cst_99 [1] : vector<16x32xf32> to vector<16xf32>
      %261 = vector.shape_cast %260 : vector<16xf32> to vector<16x1xf32>
      %cst_100 = arith.constant 3.200000e+01 : f32
      %262 = vector.broadcast %cst_100 : f32 to vector<16x1xf32>
      %263 = arith.divf %261, %262 : vector<16x1xf32>
      %264 = vector.broadcast %263 : vector<16x1xf32> to vector<16x32xf32>
      %265 = arith.subf %253, %264 : vector<16x32xf32>
      %266 = arith.mulf %265, %265 : vector<16x32xf32>
      %cst_101 = arith.constant dense<0.000000e+00> : vector<16xf32>
      %267 = vector.multi_reduction <add>, %266, %cst_101 [1] : vector<16x32xf32> to vector<16xf32>
      %268 = vector.shape_cast %267 : vector<16xf32> to vector<16x1xf32>
      %cst_102 = arith.constant 3.200000e+01 : f32
      %269 = vector.broadcast %cst_102 : f32 to vector<16x1xf32>
      %270 = arith.divf %268, %269 : vector<16x1xf32>
      %271 = vector.broadcast %263 : vector<16x1xf32> to vector<16x32xf32>
      %272 = arith.subf %253, %271 : vector<16x32xf32>
      %cst_103 = arith.constant 9.99999974E-6 : f32
      %273 = vector.broadcast %cst_103 : f32 to vector<16x1xf32>
      %274 = arith.addf %270, %273 : vector<16x1xf32>
      %275 = math.rsqrt %274 : vector<16x1xf32>
      %276 = vector.broadcast %275 : vector<16x1xf32> to vector<16x32xf32>
      %277 = arith.mulf %272, %276 : vector<16x32xf32>
      %278 = vector.broadcast %258 : vector<1x32xf32> to vector<16x32xf32>
      %279 = arith.mulf %277, %278 : vector<16x32xf32>
      %280 = vector.broadcast %259 : vector<1x32xf32> to vector<16x32xf32>
      %281 = arith.addf %279, %280 : vector<16x32xf32>
      %c0_104 = arith.constant 0 : index
      %c0_105 = arith.constant 0 : index
      %282 = vector.load %arg16[%c0_104, %c0_105] : memref<16x32xf32, #tpu.memory_space<vmem>>, vector<16x32xf32>
      tpu.vector_store %arg16[%c0_104, %c0_105], %281 {strides = array<i32>} : memref<16x32xf32, #tpu.memory_space<vmem>>, vector<16x32xf32>,
    } else {
    }
    return
  }
  func.func @transform_0(%arg0: i32) -> (i32, i32) {
    %c0_i32 = arith.constant 0 : i32
    %c0_i32_0 = arith.constant 0 : i32
    %c0_i32_1 = arith.constant 0 : i32
    return %c0_i32, %c0_i32_0 : i32, i32
  }
  func.func @transform_1(%arg0: i32) -> (i32, i32) {
    %c0_i32 = arith.constant 0 : i32
    %c0_i32_0 = arith.constant 0 : i32
    %c0_i32_1 = arith.constant 0 : i32
    return %c0_i32, %c0_i32_0 : i32, i32
  }
  func.func @transform_2(%arg0: i32) -> (i32, i32, i32) {
    %c0_i32 = arith.constant 0 : i32
    %c0_i32_0 = arith.constant 0 : i32
    %c0_i32_1 = arith.constant 0 : i32
    return %arg0, %c0_i32, %c0_i32_0 : i32, i32, i32
  }
  func.func @transform_3(%arg0: i32) -> (i32, i32, i32) {
    %c0_i32 = arith.constant 0 : i32
    %c0_i32_0 = arith.constant 0 : i32
    %c0_i32_1 = arith.constant 0 : i32
    return %arg0, %c0_i32, %c0_i32_0 : i32, i32, i32
  }
  func.func @transform_4(%arg0: i32) -> (i32, i32, i32) {
    %c0_i32 = arith.constant 0 : i32
    %c0_i32_0 = arith.constant 0 : i32
    %c0_i32_1 = arith.constant 0 : i32
    return %arg0, %c0_i32, %c0_i32_0 : i32, i32, i32
  }
  func.func @transform_5(%arg0: i32) -> (i32, i32, i32) {
    %c0_i32 = arith.constant 0 : i32
    %c0_i32_0 = arith.constant 0 : i32
    %c0_i32_1 = arith.constant 0 : i32
    return %arg0, %c0_i32, %c0_i32_0 : i32, i32, i32
  }
  func.func @transform_6(%arg0: i32) -> (i32, i32, i32) {
    %c0_i32 = arith.constant 0 : i32
    %c0_i32_0 = arith.constant 0 : i32
    %c0_i32_1 = arith.constant 0 : i32
    return %arg0, %c0_i32, %c0_i32_0 : i32, i32, i32
  }
  func.func @transform_7(%arg0: i32) -> (i32, i32, i32) {
    %c0_i32 = arith.constant 0 : i32
    %c0_i32_0 = arith.constant 0 : i32
    %c0_i32_1 = arith.constant 0 : i32
    return %arg0, %c0_i32, %c0_i32_0 : i32, i32, i32
  }
  func.func @transform_8(%arg0: i32) -> (i32, i32, i32) {
    %c0_i32 = arith.constant 0 : i32
    %c0_i32_0 = arith.constant 0 : i32
    %c0_i32_1 = arith.constant 0 : i32
    return %arg0, %c0_i32, %c0_i32_0 : i32, i32, i32
  }
  func.func @transform_9(%arg0: i32) -> (i32, i32, i32) {
    %c0_i32 = arith.constant 0 : i32
    %c0_i32_0 = arith.constant 0 : i32
    %c0_i32_1 = arith.constant 0 : i32
    return %arg0, %c0_i32, %c0_i32_0 : i32, i32, i32
  }
  func.func @transform_10(%arg0: i32) -> (i32, i32, i32) {
    %c0_i32 = arith.constant 0 : i32
    %c0_i32_0 = arith.constant 0 : i32
    %c0_i32_1 = arith.constant 0 : i32
    return %arg0, %c0_i32, %c0_i32_0 : i32, i32, i32
  }
  func.func @transform_11(%arg0: i32) -> (i32, i32, i32) {
    %c0_i32 = arith.constant 0 : i32
    %c0_i32_0 = arith.constant 0 : i32
    %c0_i32_1 = arith.constant 0 : i32
    return %arg0, %c0_i32, %c0_i32_0 : i32, i32, i32
  }
  func.func @transform_12(%arg0: i32) -> (i32, i32, i32) {
    %c0_i32 = arith.constant 0 : i32
    %c0_i32_0 = arith.constant 0 : i32
    %c0_i32_1 = arith.constant 0 : i32
    return %arg0, %c0_i32, %c0_i32_0 : i32, i32, i32
  }
  func.func @transform_13(%arg0: i32) -> (i32, i32) {
    %c0_i32 = arith.constant 0 : i32
    %c0_i32_0 = arith.constant 0 : i32
    %c0_i32_1 = arith.constant 0 : i32
    return %c0_i32, %c0_i32_0 : i32, i32
  }
  func.func @transform_14(%arg0: i32) -> (i32, i32) {
    %c0_i32 = arith.constant 0 : i32
    %c0_i32_0 = arith.constant 0 : i32
    %c0_i32_1 = arith.constant 0 : i32
    return %c0_i32, %c0_i32_0 : i32, i32
  }
  func.func @transform_15(%arg0: i32) -> (i32, i32) {
    %c0_i32 = arith.constant 0 : i32
    %c0_i32_0 = arith.constant 0 : i32
    %c0_i32_1 = arith.constant 0 : i32
    return %c0_i32, %c0_i32_0 : i32, i32
  }
}

</mosaic_0001>

<bundles_post_ra>
// kernel: tpu_custom_call.1
= control target key start
LH: loop header
LB: loop body
LE: loop exit
PB: predicated region body
PF: predicated region fallthrough
CT: control target
= control target key end

     0   :  { %s5182_s0 = inlined_call_operand.vmem [shape: f32[16,32], index: 0, kind: input, shape index: {}]   ;;  %s5183_s1 = inlined_call_operand.vmem [shape: f32[8,32], index: 1, kind: input, shape index: {}]   ;;  %s5184_s2 = inlined_call_operand.vmem [shape: f32[2,1,32], index: 2, kind: input, shape index: {}]   ;;  %s5185_s3 = inlined_call_operand.vmem [shape: f32[2,1,32], index: 3, kind: input, shape index: {}]   ;;  %s5186_s4 = inlined_call_operand.vmem [shape: bf16[2,32,1536], index: 4, kind: input, shape index: {}]   ;;  %s5187_s5 = inlined_call_operand.vmem [shape: bf16[2,512,32], index: 5, kind: input, shape index: {}]   ;;  %s5188_s6 = inlined_call_operand.vmem [shape: f32[2,1,32], index: 6, kind: input, shape index: {}]   ;;  %s5189_s7 = inlined_call_operand.vmem [shape: f32[2,1,32], index: 7, kind: input, shape index: {}]   ;;  %s5190_s8 = inlined_call_operand.vmem [shape: f32[2,1,32], index: 8, kind: input, shape index: {}]   ;;  %s5191_s9 = inlined_call_operand.vmem [shape: bf16[2,32,128], index: 9, kind: input, shape index: {}]   ;;  %s5192_s10 = inlined_call_operand.vmem [shape: f32[2,1,128], index: 10, kind: input, shape index: {}]   ;;  %s5193_s11 = inlined_call_operand.vmem [shape: bf16[2,128,32], index: 11, kind: input, shape index: {}]   ;;  %s5194_s12 = inlined_call_operand.vmem [shape: f32[2,1,32], index: 12, kind: input, shape index: {}]   ;;  %s5195_s13 = inlined_call_operand.vmem [shape: f32[1,32], index: 13, kind: input, shape index: {}]   ;;  %s5196_s14 = inlined_call_operand.vmem [shape: f32[1,32], index: 14, kind: input, shape index: {}]   ;;  %s5197_s15 = inlined_call_operand.hbm [shape: f32[16,32], index: 15, kind: output, shape index: {}]  }
   0x1   :  { %5200 = sst [smem:[#allocation7_spill]] %s5185_s3 }
   0x2   :  { %5201 = sst [smem:[#allocation8_spill]] %s5187_s5 }
   0x3   :  { %5202 = sst [smem:[#allocation9_spill]] %s5195_s13 }
   0x4   :  { %5203 = sst [smem:[#allocation10_spill]] %s5196_s14 }
   0x5   :  { %5204 = sst [smem:[#allocation11_spill]] %s5197_s15 }
   0x6   :  { %20 = vsyncpa [#allocation4], 0  ;;  %s4521_s18 = smov 0  }
   0x7 LB: > { %5205 = sst [smem:[#allocation6_spill]] %s4432_s18  ;;  %s4527_s19 = sadd.s32 4294967295, %s4432_s18   ;;  %s4432_s18 = sphi %s4521_s18, %s26_s18  }
   0x8   : > { %p3723_p0 = scmp.ge.s32.totalorder %s4432_s18, 1  ;;  %p519_p1 = scmp.lt.s32.totalorder %s4432_s18, 3 }
   0xa   : > { %p520_p2 = pnand %p3723_p0, %p519_p1 }
   0xb   : > { %p598_p3 = scmp.lt.s32.totalorder (!%p520_p2), %s4527_s19, 1  ;;  %s5207_s5 = sld [smem:[#allocation8_spill]] (!%p520_p2) }
   0xc   : > { %523 = sbr.rel (%p520_p2) target bundleno = 6579 (0x19b3), region = 80  ;;  %p3731_p4 = scmp.ne.s32.totalorder (!%p520_p2), %s4527_s19, 0 }
  0x13   : > { %s4533_s20 = scalar_select %p598_p3, %s4527_s19, 1 }
  0x14   : > { %643 = sbr.rel (%p3731_p4) target bundleno = 27 (0x1b), region = 84  ;;  %v644_v0 = vld [vmem:[%s5182_s0] sm:$0xff] (!%p3731_p4)  ;;  %vm649_vm0 = vcmask (!%p3731_p4), 261120   ;;  %v645_v2 = vld [vmem:[%s5182_s0 + $0x8] sm:$0xff] (!%p3731_p4) }
  0x15   : > { %s4194_s27 = smul.u32 192, %s4533_s20  ;;  %s3851_s28 = sshll.u32 %s4533_s20, 8  ;;  %v646_v1 = vld [vmem:[%s5183_s1] sm:$0xff] (!%p3731_p4) }
  0x16   : > { %s4548_s16 = scalar_lea.vmem %s5207_s5, %s3851_s28  ;;  %s622_s3 = scalar_lea.vmem %s5190_s8, %s4533_s20  ;;  %v647_v3 = vadd.f32 (!%p3731_p4), %v646_v1, %v644_v0  ;;  %v648_v4 = vadd.f32 (!%p3731_p4), %v646_v1, %v645_v2 }
  0x17   : > { %s4557_s14 = scalar_lea.vmem %s5186_s4, %s4194_s27  ;;  %s3852_s29 = sshll.u32 %s4533_s20, 4 }
  0x18   : > { %s4571_s5 = scalar_lea.vmem %s5191_s9, %s3852_s29  ;;  %s630_s15 = scalar_lea.vmem %s5192_s10, %s4533_s20  ;;  %650 = vst.msk [vmem:[#allocation2] sm:$0xff] (!%p3731_p4), %vm649_vm0, %v647_v3  ;;  %651 = vst.msk [vmem:[#allocation2 + $0x8] sm:$0xff] (!%p3731_p4), %vm649_vm0, %v648_v4 }
  0x19   : > { %s3853_s18 = sshll.u32 %s4533_s20, 6  ;;  %s638_s13 = scalar_lea.vmem %s5194_s12, %s4533_s20 }
  0x1a   : > { %s4585_s26 = scalar_lea.vmem %s5193_s11, %s3853_s18 }
  0x1b PF: > { %vm656_vm1 = vcmask 261120   ;;  %v4236_v19 = vld [vmem:[%s4557_s14 + $0x4] ss:$48 sps:$4 sm:$0xff]   ;;  %v4238_v20 = vld [vmem:[%s4557_s14 + $0x1c] ss:$48 sps:$4 sm:$0xff]   ;;  %v4434_v27 = vmov 0   ;;  %s5208_s18 = scalar_lea.vmem %s5184_s2, %s4533_s20  ;;  %s5211_s30 = scalar_lea.vmem %s5188_s6, %s4533_s20 }
  0x1c   : > { %v4240_v21 = vld [vmem:[%s4557_s14] ss:$48 sps:$4 sm:$0xff]   ;;  %v4241_v22 = vld [vmem:[%s4557_s14 + $0x18] ss:$48 sps:$4 sm:$0xff]   ;;  %848 = vmatprep.subr.bf16.mxu0 %v4236_v19  ;;  %977 = vmatprep.subr.bf16.mxu1 %v4238_v20  ;;  %v4242_v23 = vld [vmem:[%s4557_s14 + $0x64] ss:$48 sps:$4 sm:$0xff]  }
  0x1d   : > { %849 = vmatpush1.bf16.msra.mxu0 %v4240_v21  ;;  %978 = vmatpush1.bf16.msra.mxu1 %v4241_v22  ;;  %v4244_v24 = vld [vmem:[%s4557_s14 + $0x7c] ss:$48 sps:$4 sm:$0xff]   ;;  %v4246_v25 = vld [vmem:[%s4557_s14 + $0x60] ss:$48 sps:$4 sm:$0xff]   ;;  %v4247_v26 = vld [vmem:[%s4557_s14 + $0x78] ss:$48 sps:$4 sm:$0xff]  }
  0x1e   : > { %850 = vmatprep.subr.bf16.mxu0 %v4242_v23  ;;  %979 = vmatprep.subr.bf16.mxu1 %v4244_v24  ;;  %v4250_v28 = vld [vmem:[%s4557_s14 + $0xc] ss:$48 sps:$4 sm:$0xff]   ;;  %v3732_v38 = vld [vmem:[%s5208_s18] ss:$0 sm:$0xff]  ;;  %s5209_s25 = sld [smem:[#allocation7_spill]]  ;;  %v4435_v61 = vmov 0.0  }
  0x1f   : > { %v652_v5 = vld [vmem:[#allocation2] sm:$0xff]  ;;  %v653_v6 = vld [vmem:[#allocation2 + $0x8] sm:$0xff]  ;;  %880 = vmatprep.mubr.bf16.mxu0 %v4434_v27  ;;  %1009 = vmatprep.mubr.bf16.mxu1 %v4434_v27  ;;  %vm4436_vm2 = vmmov 0   ;;  %vm1130_vm3 = vcmask 523264   ;;  %vm1253_vm4 = vcmask 1043456   ;;  %vm1225_vm5 = vcmask 64512  }
  0x20   : > { %v657_v7 = vsel %vm656_vm1, %v652_v5, 0.0  ;;  %v660_v8 = vsel %vm656_vm1, %v653_v6, 0.0  ;;  %v4253_v29 = vld [vmem:[%s4557_s14 + $0x2c] ss:$48 sps:$4 sm:$0xff]   ;;  %v4248_v46 = vld [vmem:[%s4557_s14 + $0x8] ss:$48 sps:$4 sm:$0xff]  }
  0x21   : > { %658 = vadd.xlane.f32.xlu0 %v657_v7  ;;  %851 = vmatpush1.bf16.msra.mxu0 %v4246_v25  ;;  %v4251_v47 = vld [vmem:[%s4557_s14 + $0x28] ss:$48 sps:$4 sm:$0xff]   ;;  %v4256_v49 = vld [vmem:[%s4557_s14 + $0x6c] ss:$48 sps:$4 sm:$0xff]   ;;  %v4262_v53 = vld [vmem:[%s4557_s14 + $0x14] ss:$48 sps:$4 sm:$0xff]  }
  0x22   : > { %980 = vmatpush1.bf16.msra.mxu1 %v4247_v26  ;;  %891 = vmatprep.subr.bf16.mxu0 %v4250_v28  ;;  %v4259_v50 = vld [vmem:[%s4557_s14 + $0x8c] ss:$48 sps:$4 sm:$0xff]   ;;  %v4254_v51 = vld [vmem:[%s4557_s14 + $0x68] ss:$48 sps:$4 sm:$0xff]   ;;  %v4260_v54 = vld [vmem:[%s4557_s14 + $0x10] ss:$48 sps:$4 sm:$0xff]  }
  0x23   : > { %1063 = vmatprep.subr.bf16.mxu1 %v4253_v29  ;;  %v4257_v52 = vld [vmem:[%s4557_s14 + $0x88] ss:$48 sps:$4 sm:$0xff]   ;;  %v4265_v55 = vld [vmem:[%s4557_s14 + $0x74] ss:$48 sps:$4 sm:$0xff]   ;;  %v4263_v56 = vld [vmem:[%s4557_s14 + $0x70] ss:$48 sps:$4 sm:$0xff]  }
  0x24   : > { %s5210_s29 = scalar_lea.vmem %s5209_s25, %s4533_s20  ;;  %v4268_v57 = vld [vmem:[%s4557_s14 + $0x24] ss:$48 sps:$4 sm:$0xff]   ;;  %v4266_v58 = vld [vmem:[%s4557_s14 + $0x20] ss:$48 sps:$4 sm:$0xff]   ;;  %p3844_p5 = scmp.ne.s32.totalorder %s4527_s19, 1 }
  0x25   : > { %661 = vadd.xlane.f32.xlu0 %v660_v8  ;;  %v3733_v42 = vld [vmem:[%s5210_s29] ss:$0 sm:$0xff]  ;;  %v4271_v59 = vld [vmem:[%s4557_s14 + $0x84] ss:$48 sps:$4 sm:$0xff]   ;;  %s5213_s27 = sld [smem:[#allocation9_spill]] (!%p3844_p5)  ;;  %s5214_s29 = sld [smem:[#allocation10_spill]] (!%p3844_p5) }
  0x26   : > { %v4269_v60 = vld [vmem:[%s4557_s14 + $0x80] ss:$48 sps:$4 sm:$0xff]   ;;  %s4437_s14 = smov 64  }
  0xae   : > { %v659_v9 = vpop.xlane.xlu0 %658 }
  0xaf   : > { %v664_v10 = vmul.f32 0.03125, %v659_v9 }
  0xb1   : > { %v666_v11 = vsub.f32 %v652_v5, %v664_v10 }
  0xb2   : > { %v662_v12 = vpop.xlane.xlu0 %661 }
  0xb3   : > { %v665_v13 = vmul.f32 0.03125, %v662_v12  ;;  %v668_v14 = vmul.f32 %v666_v11, %v666_v11 }
  0xb5   : > { %v667_v15 = vsub.f32 %v653_v6, %v665_v13  ;;  %v670_v16 = vsel %vm656_vm1, %v668_v14, 0.0 }
  0xb6   : > { %671 = vadd.xlane.f32.xlu1 %v670_v16 }
  0xb7   : > { %v669_v17 = vmul.f32 %v667_v15, %v667_v15 }
  0xb9   : > { %v673_v18 = vsel %vm656_vm1, %v669_v17, 0.0 }
  0xba   : > { %674 = vadd.xlane.f32.xlu1 %v673_v18 }
 0x143   : > { %v672_v30 = vpop.xlane.xlu1 %671 }
 0x144   : > { %v676_v31 = vmul.f32 0.03125, %v672_v30 }
 0x146   : > { %v678_v32 = vadd.f32 1e-05, %v676_v31 }
 0x147   : > { %v675_v33 = vpop.xlane.xlu1 %674 }
 0x148   : > { %4314 = vrsqrt.f32 %v678_v32  ;;  %v677_v34 = vmul.f32 0.03125, %v675_v33 }
 0x14a   : > { %v679_v35 = vadd.f32 1e-05, %v677_v34 }
 0x14c   : > { %4316 = vrsqrt.f32 %v679_v35 }
 0x152   : > { %v4315_v36 = vpop.eup %4314 }
 0x153   : > { %v682_v37 = vmul.f32 %v4315_v36, %v666_v11 }
 0x155   : > { %v690_v40 = vmul.f32 %v3732_v38, %v682_v37 }
 0x156   : > { %v4317_v39 = vpop.eup %4316 }
 0x157   : > { %v683_v41 = vmul.f32 %v4317_v39, %v667_v15  ;;  %v698_v44 = vadd.f32 %v3733_v42, %v690_v40 }
 0x159   : > { %v691_v43 = vmul.f32 %v3732_v38, %v683_v41 }
 0x15b   : > { %v699_v45 = vadd.f32 %v3733_v42, %v691_v43 }
 0x15d   : > { %v700_v48 = vpack.c.bf16 %v699_v45, %v698_v44 }
 0x15f   : > { %3758 = vmatmul.mubr.msk.bf16.vlgmr.msra.gmra.mrb[0].mxu0 %vm656_vm1, %v700_v48  ;;  %3761 = vmatmul.mubr.msk.bf16.vlgmr.msra.gmra.mrb[0].mxu1 %vm656_vm1, %v700_v48 }
 0x160   : > { %892 = vmatpush1.bf16.msra.mxu0 %v4248_v46  ;;  %1064 = vmatpush1.bf16.msra.mxu1 %v4251_v47 }
 0x161   : > { %893 = vmatprep.subr.bf16.mxu0 %v4256_v49  ;;  %1065 = vmatprep.subr.bf16.mxu1 %v4259_v50 }
 0x162   : > { %923 = vmatprep.mubr.bf16.mxu0 %v4434_v27  ;;  %1095 = vmatprep.mubr.bf16.mxu1 %v4434_v27 }
 0x164   : > { %894 = vmatpush1.bf16.msra.mxu0 %v4254_v51  ;;  %1066 = vmatpush1.bf16.msra.mxu1 %v4257_v52 }
 0x165   : > { %934 = vmatprep.subr.bf16.mxu0 %v4262_v53  ;;  %3980 = vmatprep.subr.bf16.mxu1 %v4435_v61 }
 0x167   : > { %3759 = vmatmul.mubr.msk.bf16.vlgmr.msra.gmra.mrb[4].mxu0 %vm656_vm1, %v700_v48  ;;  %3763 = vmatmul.mubr.msk.bf16.vlgmr.msra.gmra.mrb[4].mxu1 %vm656_vm1, %v700_v48 }
 0x168   : > { %935 = vmatpush1.bf16.msra.mxu0 %v4260_v54  ;;  %966 = vmatprep.mubr.bf16.mxu0 %v4434_v27 }
 0x169   : > { %936 = vmatprep.subr.bf16.mxu0 %v4265_v55  ;;  %3982 = vmatprep.mubr.msk.bf16.mxu1 %vm4436_vm2, %v4435_v61 }
 0x16c   : > { %937 = vmatpush1.bf16.msra.mxu0 %v4263_v56 }
 0x16d   : > { %1020 = vmatprep.subr.bf16.mxu0 %v4268_v57 }
 0x16f   : > { %3760 = vmatmul.mubr.msk.bf16.vlgmr.msra.gmra.mrb[8].mxu0 %vm656_vm1, %v700_v48 }
 0x170   : > { %1021 = vmatpush1.bf16.msra.mxu0 %v4266_v58  ;;  %1052 = vmatprep.mubr.bf16.mxu0 %v4434_v27 }
 0x171   : > { %1022 = vmatprep.subr.bf16.mxu0 %v4271_v59 }
 0x174   : > { %1023 = vmatpush1.bf16.msra.mxu0 %v4269_v60 }
 0x175   : > { %3974 = vmatprep.subr.bf16.mxu0 %v4435_v61 }
 0x177   : > { %3762 = vmatmul.mubr.msk.bf16.vlgmr.msra.gmra.mrb[12].mxu0 %vm656_vm1, %v700_v48 }
 0x178   : > { %3976 = vmatprep.mubr.msk.bf16.mxu0 %vm4436_vm2, %v4435_v61 }
 0x232   : > { %v882_v62 = vpop.f32.mrb[0].mxu0  ;;  %v4647_v63 = vpop.f32.mrb[0].mxu1 }
 0x233   : > { %v4649_v0 = vpop.f32.mrb[1].mxu0  ;;  %v4651_v1 = vpop.f32.mrb[1].mxu1  ;;  %v1106_v23 = vpack.c.bf16 %v882_v62, %v882_v62 }
 0x234   : > { %v886_v2 = vpop.f32.mrb[2].mxu0  ;;  %v4653_v3 = vpop.f32.mrb[2].mxu1 }
 0x235   : > { %v4655_v4 = vpop.f32.mrb[3].mxu0  ;;  %v4657_v5 = vpop.f32.mrb[3].mxu1  ;;  %v1110_v27 = vpack.c.bf16 %v886_v2, %v886_v2 }
 0x23a   : > { %v4659_v6 = vpop.f32.mrb[4].mxu0  ;;  %v4661_v7 = vpop.f32.mrb[4].mxu1 }
 0x23b   : > { %v4663_v8 = vpop.f32.mrb[5].mxu0  ;;  %v4665_v9 = vpop.f32.mrb[5].mxu1 }
 0x23c   : > { %v4667_v10 = vpop.f32.mrb[6].mxu0  ;;  %v4669_v11 = vpop.f32.mrb[6].mxu1 }
 0x23d   : > { %v4671_v12 = vpop.f32.mrb[7].mxu0  ;;  %v4673_v13 = vpop.f32.mrb[7].mxu1 }
 0x242   : > { %v968_v14 = vpop.f32.mrb[8].mxu0 }
 0x243   : > { %v1114_v15 = vpack.c.bf16 %v968_v14, %v968_v14  ;;  %v4675_v16 = vpop.f32.mrb[9].mxu0 }
 0x244   : > { %v972_v17 = vpop.f32.mrb[10].mxu0 }
 0x245   : > { %v1135_v18 = vsel %vm1130_vm3, %v1114_v15, 0  ;;  %v1118_v19 = vpack.c.bf16 %v972_v17, %v972_v17  ;;  %v4678_v20 = vpop.f32.mrb[11].mxu0 }
 0x246   : > { %3975 = vmatpush3.bf16.xpose.msra.mxu0 %v1135_v18 }
 0x247   : > { %v1181_v21 = vsel %vm1130_vm3, %v1118_v19, 0  ;;  %3986 = vmatprep.subr.bf16.mxu0 %v4435_v61 }
 0x248   : > { %3981 = vmatpush3.bf16.xpose.msra.mxu1 %v1181_v21 }
 0x249   : > { %3992 = vmatprep.subr.bf16.mxu1 %v4435_v61 }
 0x24a   : > { %v1054_v22 = vpop.f32.mrb[12].mxu0 }
 0x24b   : > { %v4683_v24 = vpack.c.bf16 %v1054_v22, %v1054_v22  ;;  %v4685_v25 = vpop.f32.mrb[13].mxu0 }
 0x24c   : > { %v1058_v26 = vpop.f32.mrb[14].mxu0 }
 0x24d   : > { %v1255_v28 = vsel %vm1253_vm4, %v4683_v24, 0  ;;  %v4689_v29 = vpack.c.bf16 %v1058_v26, %v1058_v26  ;;  %v4691_v30 = vpop.f32.mrb[15].mxu0  ;;  %3977 = vmatmul.mubr.msk.bf16.vlgmr.msra.gmra.mrb[16].mxu0 %vm1130_vm3, %v1106_v23 }
 0x24e   : > { %3987 = vmatpush3.bf16.msra.mxu0 %v1255_v28  ;;  %3988 = vmatprep.mubr.msk.bf16.mxu0 %vm4436_vm2, %v4435_v61 }
 0x24f   : > { %v1301_v31 = vsel %vm1253_vm4, %v4689_v29, 0  ;;  %3983 = vmatmul.mubr.msk.bf16.vlgmr.msra.gmra.mrb[8].mxu1 %vm1130_vm3, %v1110_v27  ;;  %3998 = vmatprep.subr.bf16.mxu0 %v4435_v61 }
 0x250   : > { %3993 = vmatpush3.bf16.msra.mxu1 %v1301_v31  ;;  %3994 = vmatprep.mubr.msk.bf16.mxu1 %vm4436_vm2, %v4435_v61 }
 0x251   : > { %4004 = vmatprep.subr.bf16.mxu1 %v4435_v61 }
 0x320   : > { %v1171_v32 = vpop.f32.mrb[16].mxu0 }
 0x321   : > { %v1223_v33 = vmul.f32 0.125, %v1171_v32  ;;  %v3978_v34 = vpop.f32.mrb[17].mxu0 }
 0x322   : > { %v1174_v35 = vpop.f32.mrb[18].mxu0  ;;  %v1217_v36 = vpop.f32.mrb[8].mxu1 }
 0x323   : > { %v1224_v37 = vmul.f32 0.125, %v1217_v36  ;;  %v3979_v38 = vpop.f32.mrb[19].mxu0  ;;  %v3984_v39 = vpop.f32.mrb[9].mxu1  ;;  %v1226_v40 = vsel %vm1225_vm5, %v1223_v33, -inf }
 0x324   : > { %v1220_v41 = vpop.f32.mrb[10].mxu1  ;;  %1227 = vmax.xlane.f32.xlu0 %v1226_v40 }
 0x325   : > { %v3985_v42 = vpop.f32.mrb[11].mxu1  ;;  %v1229_v43 = vsel %vm1225_vm5, %v1224_v37, -inf }
 0x326   : > { %1230 = vmax.xlane.f32.xlu1 %v1229_v43 }
 0x337   : > { %1399 = vrot.lane.b32.xlu1 %v1118_v19, %s4437_s14 }
 0x3b1   : > { %v1228_v44 = vpop.xlane.xlu0 %1227 }
 0x3b2   : > { %v1232_v45 = vsub.f32 %v1223_v33, %v1228_v44 }
 0x3b3   : > { %v1231_v46 = vpop.xlane.xlu1 %1230 }
 0x3b4   : > { %v1234_v47 = vmul.f32 1.442695, %v1232_v45  ;;  %v1233_v48 = vsub.f32 %v1224_v37, %v1231_v46 }
 0x3b6   : > { %4318 = vpow2.f32 %v1234_v47  ;;  %v1236_v49 = vmul.f32 1.442695, %v1233_v48 }
 0x3b7   : > { %v1400_v54 = vpop.permute.xlu1 %1399 }
 0x3b8   : > { %4320 = vpow2.f32 %v1236_v49 }
 0x3c0   : > { %v4319_v50 = vpop.eup %4318 }
 0x3c1   : > { %v1238_v51 = vsel %vm1225_vm5, %v4319_v50, 0.0 }
 0x3c2   : > { %v4321_v52 = vpop.eup %4320  ;;  %1239 = vadd.xlane.f32.xlu0 %v1238_v51 }
 0x3c3   : > { %v1241_v53 = vsel %vm1225_vm5, %v4321_v52, 0.0 }
 0x3c4   : > { %1242 = vadd.xlane.f32.xlu1 %v1241_v53 }
 0x3d5   : > { %1344 = vrot.lane.b32.xlu1 %v1106_v23, %s4437_s14 }
 0x3d8   : > { %1347 = vrot.lane.b32.xlu0 %v1114_v15, %s4437_s14  ;;  %v1405_v15 = vsel %vm1130_vm3, %v1400_v54, 0 }
 0x3d9   : > { %1396 = vrot.lane.b32.xlu1 %v1110_v27, %s4437_s14 }
 0x44f   : > { %v1240_v55 = vpop.xlane.xlu0 %1239 }
 0x450   : > { %4322 = vrcp.f32 %v1240_v55 }
 0x451   : > { %v1243_v56 = vpop.xlane.xlu1 %1242 }
 0x452   : > { %4324 = vrcp.f32 %v1243_v56 }
 0x453   : > { %v1348_v60 = vpop.permute.xlu0 %1347 }
 0x454   : > { %v1353_v14 = vsel %vm1130_vm3, %v1348_v60, 0 }
 0x455   : > { %v1345_v18 = vpop.permute.xlu1 %1344 }
 0x459   : > { %v1397_v19 = vpop.permute.xlu1 %1396 }
 0x45a   : > { %v4323_v57 = vpop.eup %4322 }
 0x45b   : > { %v1246_v58 = vmul.f32 %v4323_v57, %v4319_v50 }
 0x45c   : > { %v4325_v59 = vpop.eup %4324 }
 0x45d   : > { %v1247_v62 = vmul.f32 %v4325_v59, %v4321_v52  ;;  %v1248_v2 = vpack.c.bf16 %v1246_v58, %v1246_v58 }
 0x45f   : > { %3989 = vmatmul.mubr.msk.bf16.vlgmr.msra.gmra.mrb[20].mxu0 %vm1225_vm5, %v1248_v2  ;;  %v1249_v17 = vpack.c.bf16 %v1247_v62, %v1247_v62  ;;  %v4745_v2 = vpack.c.bf16 %v4675_v16, %v4675_v16  ;;  %v4761_v16 = vpack.c.bf16 %v4685_v25, %v4685_v25 }
 0x460   : > { %3999 = vmatpush3.bf16.xpose.msra.mxu0 %v1353_v14  ;;  %4000 = vmatprep.mubr.msk.bf16.mxu0 %vm4436_vm2, %v4435_v61 }
 0x461   : > { %3995 = vmatmul.mubr.msk.bf16.vlgmr.msra.gmra.mrb[12].mxu1 %vm1225_vm5, %v1249_v17  ;;  %4010 = vmatprep.subr.bf16.mxu0 %v4435_v61 }
 0x462   : > { %4005 = vmatpush3.bf16.xpose.msra.mxu1 %v1405_v15  ;;  %4006 = vmatprep.mubr.msk.bf16.mxu1 %vm4436_vm2, %v4435_v61 }
 0x463   : > { %4016 = vmatprep.subr.bf16.mxu1 %v4435_v61 }
 0x467   : > { %4001 = vmatmul.mubr.msk.bf16.vlgmr.msra.gmra.mrb[24].mxu0 %vm1130_vm3, %v1345_v18  ;;  %v1575_v18 = vsel %vm1130_vm3, %v4745_v2, 0 }
 0x468   : > { %4012 = vmatprep.mubr.msk.bf16.mxu0 %vm4436_vm2, %v4435_v61 }
 0x469   : > { %4007 = vmatmul.mubr.msk.bf16.vlgmr.msra.gmra.mrb[16].mxu1 %vm1130_vm3, %v1397_v19 }
 0x46a   : > { %4018 = vmatprep.mubr.msk.bf16.mxu1 %vm4436_vm2, %v4435_v61 }
 0x532   : > { %v4727_v21 = vpop.f32.mrb[20].mxu0 }
 0x533   : > { %v3990_v22 = vpop.f32.mrb[21].mxu0 }
 0x534   : > { %v1294_v23 = vpop.f32.mrb[22].mxu0  ;;  %v4729_v26 = vpop.f32.mrb[12].mxu1 }
 0x535   : > { %v3991_v27 = vpop.f32.mrb[23].mxu0  ;;  %v3996_v28 = vpop.f32.mrb[13].mxu1  ;;  %v4768_v23 = vpack.c.bf16 %v4691_v30, %v4691_v30 }
 0x536   : > { %v1340_v31 = vpop.f32.mrb[14].mxu1  ;;  %v1111_v27 = vpack.c.bf16 %v4655_v4, %v4655_v4  ;;  %v1693_v28 = vsel %vm1253_vm4, %v4761_v16, 0 }
 0x537   : > { %v3997_v32 = vpop.f32.mrb[15].mxu1  ;;  %v1739_v25 = vsel %vm1253_vm4, %v4768_v23, 0 }
 0x53a   : > { %v1389_v33 = vpop.f32.mrb[24].mxu0 }
 0x53b   : > { %v1447_v34 = vmul.f32 0.125, %v1389_v33  ;;  %v4002_v35 = vpop.f32.mrb[25].mxu0 }
 0x53c   : > { %v1392_v36 = vpop.f32.mrb[26].mxu0  ;;  %v1441_v37 = vpop.f32.mrb[16].mxu1 }
 0x53d   : > { %v1448_v38 = vmul.f32 0.125, %v1441_v37  ;;  %v4003_v39 = vpop.f32.mrb[27].mxu0  ;;  %v4008_v40 = vpop.f32.mrb[17].mxu1  ;;  %v1449_v41 = vsel %vm1225_vm5, %v1447_v34, -inf }
 0x53e   : > { %v1444_v42 = vpop.f32.mrb[18].mxu1  ;;  %1450 = vmax.xlane.f32.xlu0 %v1449_v41 }
 0x53f   : > { %v4009_v43 = vpop.f32.mrb[19].mxu1  ;;  %v1452_v44 = vsel %vm1225_vm5, %v1448_v38, -inf }
 0x540   : > { %1453 = vmax.xlane.f32.xlu1 %v1452_v44 }
 0x551   : > { %1523 = vrot.lane.b32.xlu1 %v4689_v29, %s4437_s14 }
 0x5cb   : > { %v1451_v45 = vpop.xlane.xlu0 %1450 }
 0x5cc   : > { %v1455_v46 = vsub.f32 %v1447_v34, %v1451_v45 }
 0x5cd   : > { %v1454_v47 = vpop.xlane.xlu1 %1453 }
 0x5ce   : > { %v1457_v48 = vmul.f32 1.442695, %v1455_v46  ;;  %v1456_v49 = vsub.f32 %v1448_v38, %v1454_v47 }
 0x5d0   : > { %4326 = vpow2.f32 %v1457_v48  ;;  %v1459_v50 = vmul.f32 1.442695, %v1456_v49 }
 0x5d1   : > { %v1524_v51 = vpop.permute.xlu1 %1523 }
 0x5d2   : > { %4328 = vpow2.f32 %v1459_v50  ;;  %v1529_v52 = vsel %vm1253_vm4, %v1524_v51, 0 }
 0x5d3   : > { %4017 = vmatpush3.bf16.msra.mxu1 %v1529_v52 }
 0x5d4   : > { %4028 = vmatprep.subr.bf16.mxu1 %v4435_v61 }
 0x5da   : > { %v4327_v53 = vpop.eup %4326 }
 0x5db   : > { %v1461_v54 = vsel %vm1225_vm5, %v4327_v53, 0.0 }
 0x5dc   : > { %v4329_v55 = vpop.eup %4328  ;;  %1462 = vadd.xlane.f32.xlu0 %v1461_v54 }
 0x5dd   : > { %v1464_v29 = vsel %vm1225_vm5, %v4329_v55, 0.0 }
 0x5e0   : > { %1465 = vadd.xlane.f32.xlu0 %v1464_v29 }
 0x5f6   : > { %1474 = vrot.lane.b32.xlu0 %v4683_v24, %s4437_s14  ;;  %v1119_v24 = vpack.c.bf16 %v4678_v20, %v4678_v20  ;;  %v1107_v20 = vpack.c.bf16 %v4649_v0, %v4649_v0 }
 0x5f8   : > { %v1621_v22 = vsel %vm1130_vm3, %v1119_v24, 0 }
 0x669   : > { %v1463_v56 = vpop.xlane.xlu0 %1462 }
 0x66a   : > { %4330 = vrcp.f32 %v1463_v56 }
 0x66d   : > { %v1466_v57 = vpop.xlane.xlu0 %1465 }
 0x66e   : > { %4332 = vrcp.f32 %v1466_v57 }
 0x671   : > { %v1475_v58 = vpop.permute.xlu0 %1474 }
 0x672   : > { %v1480_v59 = vsel %vm1253_vm4, %v1475_v58, 0 }
 0x673   : > { %4011 = vmatpush3.bf16.msra.mxu0 %v1480_v59 }
 0x674   : > { %v4331_v60 = vpop.eup %4330  ;;  %4022 = vmatprep.subr.bf16.mxu0 %v4435_v61 }
 0x675   : > { %v1469_v62 = vmul.f32 %v4331_v60, %v4327_v53 }
 0x677   : > { %v1471_v14 = vpack.c.bf16 %v1469_v62, %v1469_v62 }
 0x678   : > { %v4333_v17 = vpop.eup %4332 }
 0x679   : > { %v1470_v15 = vmul.f32 %v4333_v17, %v4329_v55  ;;  %4013 = vmatmul.mubr.msk.bf16.vlgmr.msra.gmra.mrb[28].mxu0 %vm1225_vm5, %v1471_v14 }
 0x67a   : > { %4024 = vmatprep.mubr.msk.bf16.mxu0 %vm4436_vm2, %v4435_v61 }
 0x67b   : > { %v1472_v19 = vpack.c.bf16 %v1470_v15, %v1470_v15 }
 0x67c   : > { %4023 = vmatpush3.bf16.xpose.msra.mxu0 %v1575_v18 }
 0x67d   : > { %4019 = vmatmul.mubr.msk.bf16.vlgmr.msra.gmra.mrb[20].mxu1 %vm1225_vm5, %v1472_v19  ;;  %4034 = vmatprep.subr.bf16.mxu0 %v4435_v61 }
 0x67e   : > { %4029 = vmatpush3.bf16.xpose.msra.mxu1 %v1621_v22  ;;  %4030 = vmatprep.mubr.msk.bf16.mxu1 %vm4436_vm2, %v4435_v61 }
 0x67f   : > { %4040 = vmatprep.subr.bf16.mxu1 %v4435_v61 }
 0x683   : > { %4025 = vmatmul.mubr.msk.bf16.vlgmr.msra.gmra.mrb[32].mxu0 %vm1130_vm3, %v1107_v20 }
 0x684   : > { %4035 = vmatpush3.bf16.msra.mxu0 %v1693_v28  ;;  %4036 = vmatprep.mubr.msk.bf16.mxu0 %vm4436_vm2, %v4435_v61 }
 0x685   : > { %4031 = vmatmul.mubr.msk.bf16.vlgmr.msra.gmra.mrb[24].mxu1 %vm1130_vm3, %v1111_v27  ;;  %4046 = vmatprep.subr.bf16.mxu0 %v4435_v61 }
 0x686   : > { %4041 = vmatpush3.bf16.msra.mxu1 %v1739_v25  ;;  %4042 = vmatprep.mubr.msk.bf16.mxu1 %vm4436_vm2, %v4435_v61 }
 0x687   : > { %4052 = vmatprep.subr.bf16.mxu1 %v4435_v61 }
 0x74c   : > { %v4784_v0 = vpop.f32.mrb[28].mxu0 }
 0x74d   : > { %v4014_v4 = vpop.f32.mrb[29].mxu0 }
 0x74e   : > { %v1519_v30 = vpop.f32.mrb[30].mxu0 }
 0x74f   : > { %v4015_v31 = vpop.f32.mrb[31].mxu0 }
 0x750   : > { %v4786_v32 = vpop.f32.mrb[20].mxu1 }
 0x751   : > { %v4221_v33 = vpack.i.bf16 %v4786_v32, %v4784_v0  ;;  %v4020_v34 = vpop.f32.mrb[21].mxu1 }
 0x752   : > { %v1568_v35 = vpop.f32.mrb[22].mxu1 }
 0x753   : > { %v4021_v36 = vpop.f32.mrb[23].mxu1 }
 0x756   : > { %v1611_v37 = vpop.f32.mrb[32].mxu0 }
 0x757   : > { %v1663_v38 = vmul.f32 0.125, %v1611_v37  ;;  %v4026_v39 = vpop.f32.mrb[33].mxu0 }
 0x758   : > { %v1614_v40 = vpop.f32.mrb[34].mxu0  ;;  %v1657_v41 = vpop.f32.mrb[24].mxu1 }
 0x759   : > { %v1664_v42 = vmul.f32 0.125, %v1657_v41  ;;  %v4027_v43 = vpop.f32.mrb[35].mxu0  ;;  %v4032_v44 = vpop.f32.mrb[25].mxu1  ;;  %v1665_v45 = vsel %vm1225_vm5, %v1663_v38, -inf }
 0x75a   : > { %v1660_v46 = vpop.f32.mrb[26].mxu1  ;;  %1666 = vmax.xlane.f32.xlu1 %v1665_v45 }
 0x75b   : > { %v4033_v47 = vpop.f32.mrb[27].mxu1  ;;  %v1668_v48 = vsel %vm1225_vm5, %v1664_v42, -inf }
 0x75c   : > { %1669 = vmax.xlane.f32.xlu0 %v1668_v48 }
 0x76b   : > { %1837 = vrot.lane.b32.xlu1 %v1119_v24, %s4437_s14 }
 0x7e7   : > { %v1667_v49 = vpop.xlane.xlu1 %1666 }
 0x7e8   : > { %v1671_v50 = vsub.f32 %v1663_v38, %v1667_v49 }
 0x7e9   : > { %v1670_v51 = vpop.xlane.xlu0 %1669 }
 0x7ea   : > { %v1673_v52 = vmul.f32 1.442695, %v1671_v50  ;;  %v1672_v53 = vsub.f32 %v1664_v42, %v1670_v51 }
 0x7eb   : > { %v1838_v58 = vpop.permute.xlu1 %1837 }
 0x7ec   : > { %4334 = vpow2.f32 %v1673_v52  ;;  %v1675_v54 = vmul.f32 1.442695, %v1672_v53 }
 0x7ee   : > { %4336 = vpow2.f32 %v1675_v54 }
 0x7f6   : > { %v4335_v55 = vpop.eup %4334 }
 0x7f7   : > { %v1677_v29 = vsel %vm1225_vm5, %v4335_v55, 0.0 }
 0x7f8   : > { %v4337_v56 = vpop.eup %4336  ;;  %1678 = vadd.xlane.f32.xlu0 %v1677_v29 }
 0x7f9   : > { %v1680_v57 = vsel %vm1225_vm5, %v4337_v56, 0.0 }
 0x7fa   : > { %1681 = vadd.xlane.f32.xlu1 %v1680_v57 }
 0x80b   : > { %1782 = vrot.lane.b32.xlu1 %v1107_v20, %s4437_s14 }
 0x80e   : > { %1785 = vrot.lane.b32.xlu0 %v4745_v2, %s4437_s14  ;;  %v1843_v2 = vsel %vm1130_vm3, %v1838_v58, 0 }
 0x80f   : > { %1834 = vrot.lane.b32.xlu1 %v1111_v27, %s4437_s14 }
 0x885   : > { %v1679_v59 = vpop.xlane.xlu0 %1678 }
 0x886   : > { %4338 = vrcp.f32 %v1679_v59 }
 0x887   : > { %v1682_v60 = vpop.xlane.xlu1 %1681 }
 0x888   : > { %4340 = vrcp.f32 %v1682_v60 }
 0x889   : > { %v1786_v24 = vpop.permute.xlu0 %1785 }
 0x88a   : > { %v1791_v19 = vsel %vm1130_vm3, %v1786_v24, 0 }
 0x88b   : > { %v1783_v20 = vpop.permute.xlu1 %1782 }
 0x88f   : > { %v1835_v27 = vpop.permute.xlu1 %1834 }
 0x890   : > { %v4339_v62 = vpop.eup %4338 }
 0x891   : > { %v1685_v14 = vmul.f32 %v4339_v62, %v4335_v55 }
 0x892   : > { %v4341_v17 = vpop.eup %4340 }
 0x893   : > { %v1686_v15 = vmul.f32 %v4341_v17, %v4337_v56  ;;  %v1687_v18 = vpack.c.bf16 %v1685_v14, %v1685_v14 }
 0x895   : > { %4037 = vmatmul.mubr.msk.bf16.vlgmr.msra.gmra.mrb[36].mxu0 %vm1225_vm5, %v1687_v18  ;;  %v1688_v22 = vpack.c.bf16 %v1686_v15, %v1686_v15  ;;  %v4833_v15 = vpack.c.bf16 %v4647_v63, %v4647_v63  ;;  %v4849_v63 = vpack.c.bf16 %v4661_v7, %v4661_v7 }
 0x896   : > { %4047 = vmatpush3.bf16.xpose.msra.mxu0 %v1791_v19  ;;  %4048 = vmatprep.mubr.msk.bf16.mxu0 %vm4436_vm2, %v4435_v61 }
 0x897   : > { %4043 = vmatmul.mubr.msk.bf16.vlgmr.msra.gmra.mrb[28].mxu1 %vm1225_vm5, %v1688_v22  ;;  %4058 = vmatprep.subr.bf16.mxu0 %v4435_v61 }
 0x898   : > { %4053 = vmatpush3.bf16.xpose.msra.mxu1 %v1843_v2  ;;  %4054 = vmatprep.mubr.msk.bf16.mxu1 %vm4436_vm2, %v4435_v61  ;;  %v2013_v2 = vsel %vm1130_vm3, %v4833_v15, 0 }
 0x899   : > { %4064 = vmatprep.subr.bf16.mxu1 %v4435_v61 }
 0x89d   : > { %4049 = vmatmul.mubr.msk.bf16.vlgmr.msra.gmra.mrb[40].mxu0 %vm1130_vm3, %v1783_v20 }
 0x89e   : > { %4060 = vmatprep.mubr.msk.bf16.mxu0 %vm4436_vm2, %v4435_v61 }
 0x89f   : > { %4055 = vmatmul.mubr.msk.bf16.vlgmr.msra.gmra.mrb[32].mxu1 %vm1130_vm3, %v1835_v27 }
 0x8a0   : > { %4066 = vmatprep.mubr.msk.bf16.mxu1 %vm4436_vm2, %v4435_v61 }
 0x968   : > { %v4815_v28 = vpop.f32.mrb[36].mxu0 }
 0x969   : > { %v4038_v25 = vpop.f32.mrb[37].mxu0 }
 0x96a   : > { %v1732_v4 = vpop.f32.mrb[38].mxu0  ;;  %v4817_v30 = vpop.f32.mrb[28].mxu1  ;;  %v4856_v25 = vpack.c.bf16 %v4669_v11, %v4669_v11 }
 0x96b   : > { %v4039_v31 = vpop.f32.mrb[39].mxu0  ;;  %v4044_v34 = vpop.f32.mrb[29].mxu1  ;;  %v2131_v4 = vsel %vm1253_vm4, %v4849_v63, 0 }
 0x96c   : > { %v1778_v35 = vpop.f32.mrb[30].mxu1  ;;  %v1112_v31 = vpack.c.bf16 %v4667_v10, %v4667_v10  ;;  %v2177_v7 = vsel %vm1253_vm4, %v4856_v25, 0 }
 0x96d   : > { %v4045_v36 = vpop.f32.mrb[31].mxu1 }
 0x970   : > { %v1827_v37 = vpop.f32.mrb[40].mxu0 }
 0x971   : > { %v1885_v38 = vmul.f32 0.125, %v1827_v37  ;;  %v4050_v39 = vpop.f32.mrb[41].mxu0 }
 0x972   : > { %v1830_v40 = vpop.f32.mrb[42].mxu0  ;;  %v1879_v41 = vpop.f32.mrb[32].mxu1 }
 0x973   : > { %v1886_v42 = vmul.f32 0.125, %v1879_v41  ;;  %v4051_v43 = vpop.f32.mrb[43].mxu0  ;;  %v4056_v44 = vpop.f32.mrb[33].mxu1  ;;  %v1887_v45 = vsel %vm1225_vm5, %v1885_v38, -inf }
 0x974   : > { %1888 = vmax.xlane.f32.xlu0 %v1887_v45  ;;  %v1882_v46 = vpop.f32.mrb[34].mxu1 }
 0x975   : > { %v4057_v47 = vpop.f32.mrb[35].mxu1  ;;  %v1890_v48 = vsel %vm1225_vm5, %v1886_v42, -inf }
 0x976   : > { %1891 = vmax.xlane.f32.xlu1 %v1890_v48 }
 0x987   : > { %1961 = vrot.lane.b32.xlu1 %v4768_v23, %s4437_s14 }
 0xa01   : > { %v1889_v49 = vpop.xlane.xlu0 %1888 }
 0xa02   : > { %v1893_v50 = vsub.f32 %v1885_v38, %v1889_v49 }
 0xa03   : > { %v1892_v51 = vpop.xlane.xlu1 %1891 }
 0xa04   : > { %v1895_v52 = vmul.f32 1.442695, %v1893_v50  ;;  %v1894_v53 = vsub.f32 %v1886_v42, %v1892_v51 }
 0xa06   : > { %4342 = vpow2.f32 %v1895_v52  ;;  %v1897_v54 = vmul.f32 1.442695, %v1894_v53 }
 0xa07   : > { %v1962_v55 = vpop.permute.xlu1 %1961 }
 0xa08   : > { %4344 = vpow2.f32 %v1897_v54  ;;  %v1967_v29 = vsel %vm1253_vm4, %v1962_v55, 0 }
 0xa09   : > { %4065 = vmatpush3.bf16.msra.mxu1 %v1967_v29 }
 0xa0a   : > { %4076 = vmatprep.subr.bf16.mxu1 %v4435_v61 }
 0xa10   : > { %v4343_v56 = vpop.eup %4342 }
 0xa11   : > { %v1899_v57 = vsel %vm1225_vm5, %v4343_v56, 0.0 }
 0xa12   : > { %v4345_v58 = vpop.eup %4344  ;;  %1900 = vadd.xlane.f32.xlu0 %v1899_v57 }
 0xa13   : > { %v1902_v23 = vsel %vm1225_vm5, %v4345_v58, 0.0 }
 0xa16   : > { %1903 = vadd.xlane.f32.xlu0 %v1902_v23 }
 0xa2c   : > { %1912 = vrot.lane.b32.xlu0 %v4761_v16, %s4437_s14  ;;  %v1120_v16 = vpack.c.bf16 %v4653_v3, %v4653_v3  ;;  %v1108_v3 = vpack.c.bf16 %v4659_v6, %v4659_v6 }
 0xa2e   : > { %v2059_v27 = vsel %vm1130_vm3, %v1120_v16, 0 }
 0xa9f   : > { %v1901_v59 = vpop.xlane.xlu0 %1900 }
 0xaa0   : > { %4346 = vrcp.f32 %v1901_v59 }
 0xaa3   : > { %v1904_v60 = vpop.xlane.xlu0 %1903 }
 0xaa4   : > { %4348 = vrcp.f32 %v1904_v60 }
 0xaa7   : > { %v1913_v62 = vpop.permute.xlu0 %1912 }
 0xaa8   : > { %v1918_v14 = vsel %vm1253_vm4, %v1913_v62, 0 }
 0xaa9   : > { %4059 = vmatpush3.bf16.msra.mxu0 %v1918_v14 }
 0xaaa   : > { %v4347_v17 = vpop.eup %4346  ;;  %4070 = vmatprep.subr.bf16.mxu0 %v4435_v61 }
 0xaab   : > { %v1907_v24 = vmul.f32 %v4347_v17, %v4343_v56 }
 0xaad   : > { %v1909_v18 = vpack.c.bf16 %v1907_v24, %v1907_v24 }
 0xaae   : > { %v4349_v19 = vpop.eup %4348 }
 0xaaf   : > { %v1908_v22 = vmul.f32 %v4349_v19, %v4345_v58  ;;  %4061 = vmatmul.mubr.msk.bf16.vlgmr.msra.gmra.mrb[44].mxu0 %vm1225_vm5, %v1909_v18 }
 0xab0   : > { %4072 = vmatprep.mubr.msk.bf16.mxu0 %vm4436_vm2, %v4435_v61 }
 0xab1   : > { %v1910_v20 = vpack.c.bf16 %v1908_v22, %v1908_v22 }
 0xab2   : > { %4071 = vmatpush3.bf16.xpose.msra.mxu0 %v2013_v2 }
 0xab3   : > { %4067 = vmatmul.mubr.msk.bf16.vlgmr.msra.gmra.mrb[36].mxu1 %vm1225_vm5, %v1910_v20  ;;  %4082 = vmatprep.subr.bf16.mxu0 %v4435_v61 }
 0xab4   : > { %4077 = vmatpush3.bf16.xpose.msra.mxu1 %v2059_v27  ;;  %4078 = vmatprep.mubr.msk.bf16.mxu1 %vm4436_vm2, %v4435_v61 }
 0xab5   : > { %4088 = vmatprep.subr.bf16.mxu1 %v4435_v61 }
 0xab9   : > { %4073 = vmatmul.mubr.msk.bf16.vlgmr.msra.gmra.mrb[48].mxu0 %vm1130_vm3, %v1108_v3 }
 0xaba   : > { %4083 = vmatpush3.bf16.msra.mxu0 %v2131_v4  ;;  %4084 = vmatprep.mubr.msk.bf16.mxu0 %vm4436_vm2, %v4435_v61 }
 0xabb   : > { %4079 = vmatmul.mubr.msk.bf16.vlgmr.msra.gmra.mrb[40].mxu1 %vm1130_vm3, %v1112_v31  ;;  %4094 = vmatprep.subr.bf16.mxu0 %v4435_v61 }
 0xabc   : > { %4089 = vmatpush3.bf16.msra.mxu1 %v2177_v7  ;;  %4090 = vmatprep.mubr.msk.bf16.mxu1 %vm4436_vm2, %v4435_v61 }
 0xabd   : > { %4100 = vmatprep.subr.bf16.mxu1 %v4435_v61 }
 0xb82   : > { %v4872_v6 = vpop.f32.mrb[44].mxu0 }
 0xb83   : > { %v4062_v10 = vpop.f32.mrb[45].mxu0 }
 0xb84   : > { %v1957_v11 = vpop.f32.mrb[46].mxu0 }
 0xb85   : > { %v4063_v34 = vpop.f32.mrb[47].mxu0 }
 0xb86   : > { %v4874_v35 = vpop.f32.mrb[36].mxu1 }
 0xb87   : > { %v4216_v36 = vpack.i.bf16 %v4874_v35, %v4872_v6  ;;  %v4068_v37 = vpop.f32.mrb[37].mxu1 }
 0xb88   : > { %v2006_v38 = vpop.f32.mrb[38].mxu1 }
 0xb89   : > { %v4069_v39 = vpop.f32.mrb[39].mxu1 }
 0xb8c   : > { %v2049_v40 = vpop.f32.mrb[48].mxu0 }
 0xb8d   : > { %v2101_v41 = vmul.f32 0.125, %v2049_v40  ;;  %v4074_v42 = vpop.f32.mrb[49].mxu0 }
 0xb8e   : > { %v2052_v43 = vpop.f32.mrb[50].mxu0  ;;  %v2095_v44 = vpop.f32.mrb[40].mxu1 }
 0xb8f   : > { %v2102_v45 = vmul.f32 0.125, %v2095_v44  ;;  %v4075_v46 = vpop.f32.mrb[51].mxu0  ;;  %v4080_v47 = vpop.f32.mrb[41].mxu1  ;;  %v2103_v48 = vsel %vm1225_vm5, %v2101_v41, -inf }
 0xb90   : > { %2104 = vmax.xlane.f32.xlu1 %v2103_v48  ;;  %v2098_v49 = vpop.f32.mrb[42].mxu1 }
 0xb91   : > { %v4081_v50 = vpop.f32.mrb[43].mxu1  ;;  %v2106_v51 = vsel %vm1225_vm5, %v2102_v45, -inf }
 0xb92   : > { %2107 = vmax.xlane.f32.xlu0 %v2106_v51 }
 0xba1   : > { %2275 = vrot.lane.b32.xlu1 %v1120_v16, %s4437_s14 }
 0xc1d   : > { %v2105_v52 = vpop.xlane.xlu1 %2104 }
 0xc1e   : > { %v2109_v53 = vsub.f32 %v2101_v41, %v2105_v52 }
 0xc1f   : > { %v2108_v54 = vpop.xlane.xlu0 %2107 }
 0xc20   : > { %v2111_v55 = vmul.f32 1.442695, %v2109_v53  ;;  %v2110_v29 = vsub.f32 %v2102_v45, %v2108_v54 }
 0xc21   : > { %v2276_v60 = vpop.permute.xlu1 %2275 }
 0xc22   : > { %4350 = vpow2.f32 %v2111_v55  ;;  %v2113_v56 = vmul.f32 1.442695, %v2110_v29 }
 0xc24   : > { %4352 = vpow2.f32 %v2113_v56 }
 0xc2c   : > { %v4351_v57 = vpop.eup %4350 }
 0xc2d   : > { %v2115_v58 = vsel %vm1225_vm5, %v4351_v57, 0.0 }
 0xc2e   : > { %v4353_v23 = vpop.eup %4352  ;;  %2116 = vadd.xlane.f32.xlu0 %v2115_v58 }
 0xc2f   : > { %v2118_v59 = vsel %vm1225_vm5, %v4353_v23, 0.0 }
 0xc30   : > { %2119 = vadd.xlane.f32.xlu1 %v2118_v59 }
 0xc41   : > { %2220 = vrot.lane.b32.xlu1 %v1108_v3, %s4437_s14 }
 0xc44   : > { %2223 = vrot.lane.b32.xlu0 %v4833_v15, %s4437_s14  ;;  %v2281_v15 = vsel %vm1130_vm3, %v2276_v60, 0 }
 0xc45   : > { %2272 = vrot.lane.b32.xlu1 %v1112_v31, %s4437_s14 }
 0xcbb   : > { %v2117_v62 = vpop.xlane.xlu0 %2116 }
 0xcbc   : > { %4354 = vrcp.f32 %v2117_v62 }
 0xcbd   : > { %v2120_v14 = vpop.xlane.xlu1 %2119 }
 0xcbe   : > { %4356 = vrcp.f32 %v2120_v14 }
 0xcbf   : > { %v2224_v19 = vpop.permute.xlu0 %2223 }
 0xcc0   : > { %v2229_v2 = vsel %vm1130_vm3, %v2224_v19, 0  ;;  %v4921_v19 = vpack.c.bf16 %v4651_v1, %v4651_v1  ;;  %v4937_v1 = vpack.c.bf16 %v4665_v9, %v4665_v9 }
 0xcc1   : > { %v2221_v27 = vpop.permute.xlu1 %2220 }
 0xcc5   : > { %v2273_v3 = vpop.permute.xlu1 %2272 }
 0xcc6   : > { %v4355_v17 = vpop.eup %4354 }
 0xcc7   : > { %v2123_v24 = vmul.f32 %v4355_v17, %v4351_v57 }
 0xcc8   : > { %v4357_v18 = vpop.eup %4356 }
 0xcc9   : > { %v2124_v16 = vmul.f32 %v4357_v18, %v4353_v23  ;;  %v2125_v22 = vpack.c.bf16 %v2123_v24, %v2123_v24 }
 0xccb   : > { %4085 = vmatmul.mubr.msk.bf16.vlgmr.msra.gmra.mrb[52].mxu0 %vm1225_vm5, %v2125_v22  ;;  %v2126_v20 = vpack.c.bf16 %v2124_v16, %v2124_v16 }
 0xccc   : > { %4095 = vmatpush3.bf16.xpose.msra.mxu0 %v2229_v2  ;;  %4096 = vmatprep.mubr.msk.bf16.mxu0 %vm4436_vm2, %v4435_v61 }
 0xccd   : > { %4091 = vmatmul.mubr.msk.bf16.vlgmr.msra.gmra.mrb[44].mxu1 %vm1225_vm5, %v2126_v20  ;;  %4106 = vmatprep.subr.bf16.mxu0 %v4435_v61  ;;  %v2451_v20 = vsel %vm1130_vm3, %v4921_v19, 0 }
 0xcce   : > { %4101 = vmatpush3.bf16.xpose.msra.mxu1 %v2281_v15  ;;  %4102 = vmatprep.mubr.msk.bf16.mxu1 %vm4436_vm2, %v4435_v61 }
 0xccf   : > { %4112 = vmatprep.subr.bf16.mxu1 %v4435_v61 }
 0xcd3   : > { %4097 = vmatmul.mubr.msk.bf16.vlgmr.msra.gmra.mrb[56].mxu0 %vm1130_vm3, %v2221_v27 }
 0xcd4   : > { %4108 = vmatprep.mubr.msk.bf16.mxu0 %vm4436_vm2, %v4435_v61 }
 0xcd5   : > { %4103 = vmatmul.mubr.msk.bf16.vlgmr.msra.gmra.mrb[48].mxu1 %vm1130_vm3, %v2273_v3  ;;  %v4944_v3 = vpack.c.bf16 %v4673_v13, %v4673_v13 }
 0xcd6   : > { %4114 = vmatprep.mubr.msk.bf16.mxu1 %vm4436_vm2, %v4435_v61 }
 0xcd7   : > { %v2615_v9 = vsel %vm1253_vm4, %v4944_v3, 0 }
 0xd9e   : > { %v4903_v4 = vpop.f32.mrb[52].mxu0 }
 0xd9f   : > { %v4086_v31 = vpop.f32.mrb[53].mxu0 }
 0xda0   : > { %v2170_v7 = vpop.f32.mrb[54].mxu0  ;;  %v4905_v10 = vpop.f32.mrb[44].mxu1  ;;  %v2569_v31 = vsel %vm1253_vm4, %v4937_v1, 0 }
 0xda1   : > { %v4087_v11 = vpop.f32.mrb[55].mxu0  ;;  %v4092_v34 = vpop.f32.mrb[45].mxu1  ;;  %v1113_v7 = vpack.c.bf16 %v4671_v12, %v4671_v12 }
 0xda2   : > { %v2216_v37 = vpop.f32.mrb[46].mxu1 }
 0xda3   : > { %v4093_v38 = vpop.f32.mrb[47].mxu1 }
 0xda6   : > { %v2265_v39 = vpop.f32.mrb[56].mxu0 }
 0xda7   : > { %v2323_v40 = vmul.f32 0.125, %v2265_v39  ;;  %v4098_v41 = vpop.f32.mrb[57].mxu0 }
 0xda8   : > { %v2268_v42 = vpop.f32.mrb[58].mxu0  ;;  %v2317_v43 = vpop.f32.mrb[48].mxu1 }
 0xda9   : > { %v2324_v44 = vmul.f32 0.125, %v2317_v43  ;;  %v4099_v45 = vpop.f32.mrb[59].mxu0  ;;  %v4104_v46 = vpop.f32.mrb[49].mxu1  ;;  %v2325_v47 = vsel %vm1225_vm5, %v2323_v40, -inf }
 0xdaa   : > { %2326 = vmax.xlane.f32.xlu0 %v2325_v47  ;;  %v2320_v48 = vpop.f32.mrb[50].mxu1 }
 0xdab   : > { %v4105_v49 = vpop.f32.mrb[51].mxu1  ;;  %v2328_v50 = vsel %vm1225_vm5, %v2324_v44, -inf }
 0xdac   : > { %2329 = vmax.xlane.f32.xlu1 %v2328_v50 }
 0xdbd   : > { %2399 = vrot.lane.b32.xlu1 %v4856_v25, %s4437_s14 }
 0xe37   : > { %v2327_v51 = vpop.xlane.xlu0 %2326 }
 0xe38   : > { %v2331_v52 = vsub.f32 %v2323_v40, %v2327_v51 }
 0xe39   : > { %v2330_v53 = vpop.xlane.xlu1 %2329 }
 0xe3a   : > { %v2333_v54 = vmul.f32 1.442695, %v2331_v52  ;;  %v2332_v55 = vsub.f32 %v2324_v44, %v2330_v53 }
 0xe3c   : > { %4358 = vpow2.f32 %v2333_v54  ;;  %v2335_v29 = vmul.f32 1.442695, %v2332_v55 }
 0xe3d   : > { %v2400_v56 = vpop.permute.xlu1 %2399 }
 0xe3e   : > { %4360 = vpow2.f32 %v2335_v29  ;;  %v2405_v57 = vsel %vm1253_vm4, %v2400_v56, 0 }
 0xe3f   : > { %4113 = vmatpush3.bf16.msra.mxu1 %v2405_v57 }
 0xe40   : > { %4124 = vmatprep.subr.bf16.mxu1 %v4435_v61 }
 0xe46   : > { %v4359_v58 = vpop.eup %4358 }
 0xe47   : > { %v2337_v23 = vsel %vm1225_vm5, %v4359_v58, 0.0 }
 0xe48   : > { %v4361_v59 = vpop.eup %4360  ;;  %2338 = vadd.xlane.f32.xlu0 %v2337_v23 }
 0xe49   : > { %v2340_v25 = vsel %vm1225_vm5, %v4361_v59, 0.0 }
 0xe4c   : > { %2341 = vadd.xlane.f32.xlu0 %v2340_v25 }
 0xe62   : > { %2350 = vrot.lane.b32.xlu0 %v4849_v63, %s4437_s14  ;;  %v1121_v63 = vpack.c.bf16 %v4657_v5, %v4657_v5  ;;  %v1109_v5 = vpack.c.bf16 %v4663_v8, %v4663_v8 }
 0xe64   : > { %v2497_v27 = vsel %vm1130_vm3, %v1121_v63, 0 }
 0xed5   : > { %v2339_v60 = vpop.xlane.xlu0 %2338 }
 0xed6   : > { %4362 = vrcp.f32 %v2339_v60 }
 0xed9   : > { %v2342_v62 = vpop.xlane.xlu0 %2341 }
 0xeda   : > { %4364 = vrcp.f32 %v2342_v62 }
 0xedd   : > { %v2351_v14 = vpop.permute.xlu0 %2350 }
 0xede   : > { %v2356_v17 = vsel %vm1253_vm4, %v2351_v14, 0 }
 0xedf   : > { %4107 = vmatpush3.bf16.msra.mxu0 %v2356_v17 }
 0xee0   : > { %v4363_v24 = vpop.eup %4362  ;;  %4118 = vmatprep.subr.bf16.mxu0 %v4435_v61 }
 0xee1   : > { %v2345_v18 = vmul.f32 %v4363_v24, %v4359_v58 }
 0xee3   : > { %v2347_v16 = vpack.c.bf16 %v2345_v18, %v2345_v18 }
 0xee4   : > { %v4365_v22 = vpop.eup %4364 }
 0xee5   : > { %v2346_v2 = vmul.f32 %v4365_v22, %v4361_v59  ;;  %4109 = vmatmul.mubr.msk.bf16.vlgmr.msra.gmra.mrb[60].mxu0 %vm1225_vm5, %v2347_v16 }
 0xee6   : > { %4120 = vmatprep.mubr.msk.bf16.mxu0 %vm4436_vm2, %v4435_v61 }
 0xee7   : > { %v2348_v15 = vpack.c.bf16 %v2346_v2, %v2346_v2 }
 0xee8   : > { %4119 = vmatpush3.bf16.xpose.msra.mxu0 %v2451_v20 }
 0xee9   : > { %4115 = vmatmul.mubr.msk.bf16.vlgmr.msra.gmra.mrb[52].mxu1 %vm1225_vm5, %v2348_v15  ;;  %4130 = vmatprep.subr.bf16.mxu0 %v4435_v61 }
 0xeea   : > { %4125 = vmatpush3.bf16.xpose.msra.mxu1 %v2497_v27  ;;  %4126 = vmatprep.mubr.msk.bf16.mxu1 %vm4436_vm2, %v4435_v61 }
 0xeeb   : > { %4136 = vmatprep.subr.bf16.mxu1 %v4435_v61 }
 0xeef   : > { %4121 = vmatmul.mubr.msk.bf16.vlgmr.msra.gmra.mrb[64].mxu0 %vm1130_vm3, %v1109_v5 }
 0xef0   : > { %4131 = vmatpush3.bf16.msra.mxu0 %v2569_v31  ;;  %4132 = vmatprep.mubr.msk.bf16.mxu0 %vm4436_vm2, %v4435_v61 }
 0xef1   : > { %4127 = vmatmul.mubr.msk.bf16.vlgmr.msra.gmra.mrb[56].mxu1 %vm1130_vm3, %v1113_v7  ;;  %4142 = vmatprep.subr.bf16.mxu0 %v4435_v61 }
 0xef2   : > { %4137 = vmatpush3.bf16.msra.mxu1 %v2615_v9  ;;  %4138 = vmatprep.mubr.msk.bf16.mxu1 %vm4436_vm2, %v4435_v61 }
 0xef3   : > { %4148 = vmatprep.subr.bf16.mxu1 %v4435_v61 }
 0xfb8   : > { %v4960_v8 = vpop.f32.mrb[60].mxu0 }
 0xfb9   : > { %v4110_v12 = vpop.f32.mrb[61].mxu0 }
 0xfba   : > { %v2395_v13 = vpop.f32.mrb[62].mxu0 }
 0xfbb   : > { %v4111_v11 = vpop.f32.mrb[63].mxu0 }
 0xfbc   : > { %v4962_v34 = vpop.f32.mrb[52].mxu1 }
 0xfbd   : > { %v4231_v37 = vpack.i.bf16 %v4962_v34, %v4960_v8  ;;  %v4116_v38 = vpop.f32.mrb[53].mxu1 }
 0xfbe   : > { %v2444_v39 = vpop.f32.mrb[54].mxu1 }
 0xfbf   : > { %v4117_v40 = vpop.f32.mrb[55].mxu1 }
 0xfc2   : > { %v2487_v41 = vpop.f32.mrb[64].mxu0 }
 0xfc3   : > { %v2539_v42 = vmul.f32 0.125, %v2487_v41  ;;  %v4122_v43 = vpop.f32.mrb[65].mxu0 }
 0xfc4   : > { %v2490_v44 = vpop.f32.mrb[66].mxu0  ;;  %v2533_v45 = vpop.f32.mrb[56].mxu1 }
 0xfc5   : > { %v2540_v46 = vmul.f32 0.125, %v2533_v45  ;;  %v4123_v47 = vpop.f32.mrb[67].mxu0  ;;  %v4128_v48 = vpop.f32.mrb[57].mxu1  ;;  %v2541_v49 = vsel %vm1225_vm5, %v2539_v42, -inf }
 0xfc6   : > { %2542 = vmax.xlane.f32.xlu1 %v2541_v49  ;;  %v2536_v50 = vpop.f32.mrb[58].mxu1 }
 0xfc7   : > { %v4129_v51 = vpop.f32.mrb[59].mxu1  ;;  %v2544_v52 = vsel %vm1225_vm5, %v2540_v46, -inf }
 0xfc8   : > { %2545 = vmax.xlane.f32.xlu0 %v2544_v52 }
 0xfd7   : > { %2713 = vrot.lane.b32.xlu1 %v1121_v63, %s4437_s14 }
0x1053   : > { %v2543_v53 = vpop.xlane.xlu1 %2542 }
0x1054   : > { %v2547_v54 = vsub.f32 %v2539_v42, %v2543_v53 }
0x1055   : > { %v2546_v55 = vpop.xlane.xlu0 %2545 }
0x1056   : > { %v2549_v29 = vmul.f32 1.442695, %v2547_v54  ;;  %v2548_v56 = vsub.f32 %v2540_v46, %v2546_v55 }
0x1057   : > { %v2714_v60 = vpop.permute.xlu1 %2713 }
0x1058   : > { %4366 = vpow2.f32 %v2549_v29  ;;  %v2551_v57 = vmul.f32 1.442695, %v2548_v56 }
0x105a   : > { %4368 = vpow2.f32 %v2551_v57 }
0x1062   : > { %v4367_v58 = vpop.eup %4366 }
0x1063   : > { %v2553_v23 = vsel %vm1225_vm5, %v4367_v58, 0.0 }
0x1064   : > { %v4369_v59 = vpop.eup %4368  ;;  %2554 = vadd.xlane.f32.xlu0 %v2553_v23 }
0x1065   : > { %v2556_v25 = vsel %vm1225_vm5, %v4369_v59, 0.0 }
0x1066   : > { %2557 = vadd.xlane.f32.xlu1 %v2556_v25 }
0x1077   : > { %2658 = vrot.lane.b32.xlu1 %v1109_v5, %s4437_s14 }
0x107a   : > { %2661 = vrot.lane.b32.xlu0 %v4921_v19, %s4437_s14  ;;  %v2719_v19 = vsel %vm1130_vm3, %v2714_v60, 0 }
0x107b   : > { %2710 = vrot.lane.b32.xlu1 %v1113_v7, %s4437_s14 }
0x10f1   : > { %v2555_v62 = vpop.xlane.xlu0 %2554 }
0x10f2   : > { %4370 = vrcp.f32 %v2555_v62 }
0x10f3   : > { %v2558_v14 = vpop.xlane.xlu1 %2557 }
0x10f4   : > { %4372 = vrcp.f32 %v2558_v14 }
0x10f5   : > { %v2662_v16 = vpop.permute.xlu0 %2661 }
0x10f6   : > { %v2667_v2 = vsel %vm1130_vm3, %v2662_v16, 0 }
0x10f7   : > { %v2659_v15 = vpop.permute.xlu1 %2658 }
0x10fb   : > { %v2711_v27 = vpop.permute.xlu1 %2710 }
0x10fc   : > { %v4371_v17 = vpop.eup %4370 }
0x10fd   : > { %v2561_v24 = vmul.f32 %v4371_v17, %v4367_v58 }
0x10fe   : > { %v4373_v18 = vpop.eup %4372 }
0x10ff   : > { %v2562_v22 = vmul.f32 %v4373_v18, %v4369_v59  ;;  %v2563_v63 = vpack.c.bf16 %v2561_v24, %v2561_v24 }
0x1101   : > { %4133 = vmatmul.mubr.msk.bf16.vlgmr.msra.gmra.mrb[68].mxu0 %vm1225_vm5, %v2563_v63  ;;  %v2564_v20 = vpack.c.bf16 %v2562_v22, %v2562_v22 }
0x1102   : > { %4143 = vmatpush3.bf16.xpose.msra.mxu0 %v2667_v2  ;;  %4144 = vmatprep.mubr.msk.bf16.mxu0 %vm4436_vm2, %v4435_v61  ;;  %v4273_v2 = vld [vmem:[%s4548_s16] sm:$0xff]  }
0x1103   : > { %4139 = vmatmul.mubr.msk.bf16.vlgmr.msra.gmra.mrb[60].mxu1 %vm1225_vm5, %v2564_v20  ;;  %4154 = vmatprep.subr.bf16.mxu0 %v4435_v61 }
0x1104   : > { %4149 = vmatpush3.bf16.xpose.msra.mxu1 %v2719_v19  ;;  %4150 = vmatprep.mubr.msk.bf16.mxu1 %vm4436_vm2, %v4435_v61  ;;  %v4274_v19 = vld [vmem:[%s4548_s16 + $0x48] sm:$0xff]  }
0x1105   : > { %4160 = vmatprep.subr.bf16.mxu1 %v4435_v61 }
0x1109   : > { %4145 = vmatmul.mubr.msk.bf16.vlgmr.msra.gmra.mrb[72].mxu0 %vm1130_vm3, %v2659_v15 }
0x110a   : > { %4156 = vmatprep.mubr.msk.bf16.mxu0 %vm4436_vm2, %v4435_v61 }
0x110b   : > { %4151 = vmatmul.mubr.msk.bf16.vlgmr.msra.gmra.mrb[64].mxu1 %vm1130_vm3, %v2711_v27  ;;  %v4275_v27 = vld [vmem:[%s4548_s16 + $0x8] sm:$0xff]  }
0x110c   : > { %4162 = vmatprep.mubr.msk.bf16.mxu1 %vm4436_vm2, %v4435_v61 }
0x11d4   : > { %v4991_v5 = vpop.f32.mrb[68].mxu0 }
0x11d5   : > { %v4134_v31 = vpop.f32.mrb[69].mxu0 }
0x11d6   : > { %v2608_v7 = vpop.f32.mrb[70].mxu0  ;;  %v4993_v9 = vpop.f32.mrb[60].mxu1 }
0x11d7   : > { %v4135_v12 = vpop.f32.mrb[71].mxu0  ;;  %v4140_v13 = vpop.f32.mrb[61].mxu1  ;;  %v4276_v7 = vld [vmem:[%s4548_s16 + $0x50] sm:$0xff]  }
0x11d8   : > { %v2654_v11 = vpop.f32.mrb[62].mxu1  ;;  %v4277_v12 = vld [vmem:[%s4548_s16 + $0x10] sm:$0xff]   ;;  %v4278_v13 = vld [vmem:[%s4548_s16 + $0x58] sm:$0xff]  }
0x11d9   : > { %v4141_v38 = vpop.f32.mrb[63].mxu1  ;;  %v4279_v11 = vld [vmem:[%s4548_s16 + $0x18] sm:$0xff]  }
0x11da   : > { %v4280_v38 = vld [vmem:[%s4548_s16 + $0x60] sm:$0xff]  }
0x11dc   : > { %v2703_v39 = vpop.f32.mrb[72].mxu0 }
0x11dd   : > { %v2761_v40 = vmul.f32 0.125, %v2703_v39  ;;  %v4146_v41 = vpop.f32.mrb[73].mxu0  ;;  %v4281_v39 = vld [vmem:[%s4548_s16 + $0x20] sm:$0xff]  }
0x11de   : > { %v2706_v42 = vpop.f32.mrb[74].mxu0  ;;  %v2755_v43 = vpop.f32.mrb[64].mxu1  ;;  %v4283_v41 = vld [vmem:[%s4548_s16 + $0x28] sm:$0xff]  }
0x11df   : > { %v2762_v44 = vmul.f32 0.125, %v2755_v43  ;;  %v4147_v45 = vpop.f32.mrb[75].mxu0  ;;  %v4152_v46 = vpop.f32.mrb[65].mxu1  ;;  %v2763_v47 = vsel %vm1225_vm5, %v2761_v40, -inf  ;;  %v4284_v42 = vld [vmem:[%s4548_s16 + $0x70] sm:$0xff]  }
0x11e0   : > { %2764 = vmax.xlane.f32.xlu0 %v2763_v47  ;;  %v2758_v48 = vpop.f32.mrb[66].mxu1  ;;  %v4285_v43 = vld [vmem:[%s4548_s16 + $0x30] sm:$0xff]   ;;  %v4287_v45 = vld [vmem:[%s4548_s16 + $0x38] sm:$0xff]   ;;  %v4288_v46 = vld [vmem:[%s4548_s16 + $0xc0] sm:$0xff]  }
0x11e1   : > { %v4153_v49 = vpop.f32.mrb[67].mxu1  ;;  %v2766_v50 = vsel %vm1225_vm5, %v2762_v44, -inf  ;;  %v4289_v47 = vld [vmem:[%s4548_s16 + $0x80] sm:$0xff]   ;;  %v4290_v48 = vld [vmem:[%s4548_s16 + $0xc8] sm:$0xff]  }
0x11e2   : > { %2767 = vmax.xlane.f32.xlu1 %v2766_v50  ;;  %v4291_v49 = vld [vmem:[%s4548_s16 + $0x88] sm:$0xff]   ;;  %v4292_v50 = vld [vmem:[%s4548_s16 + $0xd0] sm:$0xff]  }
0x11f3   : > { %2837 = vrot.lane.b32.xlu1 %v4944_v3, %s4437_s14 }
0x11f7   : > { %4217 = vrot.lane.b32.xlu1 %v4216_v36, %s4437_s14 }
0x11fb   : > { %4222 = vrot.lane.b32.xlu1 %v4221_v33, %s4437_s14 }
0x11ff   : > { %4232 = vrot.lane.b32.xlu1 %v4231_v37, %s4437_s14 }
0x126d   : > { %v2765_v51 = vpop.xlane.xlu0 %2764 }
0x126e   : > { %v2769_v52 = vsub.f32 %v2761_v40, %v2765_v51  ;;  %v4282_v40 = vld [vmem:[%s4548_s16 + $0x68] sm:$0xff]   ;;  %v4293_v51 = vld [vmem:[%s4548_s16 + $0x90] sm:$0xff]  }
0x126f   : > { %v2768_v53 = vpop.xlane.xlu1 %2767 }
0x1270   : > { %v2771_v54 = vmul.f32 1.442695, %v2769_v52  ;;  %v2770_v3 = vsub.f32 %v2762_v44, %v2768_v53  ;;  %v4286_v44 = vld [vmem:[%s4548_s16 + $0x78] sm:$0xff]  }
0x1271   : > { %v4294_v52 = vld [vmem:[%s4548_s16 + $0xd8] sm:$0xff]  }
0x1272   : > { %4374 = vpow2.f32 %v2771_v54  ;;  %v2773_v55 = vmul.f32 1.442695, %v2770_v3  ;;  %v4295_v53 = vld [vmem:[%s4548_s16 + $0x98] sm:$0xff]   ;;  %v4296_v54 = vld [vmem:[%s4548_s16 + $0xe0] sm:$0xff]  }
0x1273   : > { %v2838_v29 = vpop.permute.xlu1 %2837  ;;  %v4297_v3 = vld [vmem:[%s4548_s16 + $0xa0] sm:$0xff]  }
0x1274   : > { %4376 = vpow2.f32 %v2773_v55  ;;  %v2843_v6 = vsel %vm1253_vm4, %v2838_v29, 0  ;;  %v4298_v55 = vld [vmem:[%s4548_s16 + $0xe8] sm:$0xff]  }
0x1275   : > { %4161 = vmatpush3.bf16.msra.mxu1 %v2843_v6  ;;  %v4299_v29 = vld [vmem:[%s4548_s16 + $0xa8] sm:$0xff]   ;;  %v4300_v6 = vld [vmem:[%s4548_s16 + $0xf0] sm:$0xff]  }
0x1276   : > { %3940 = vmatprep.subr.bf16.mxu1 %v4288_v46 }
0x1277   : > { %v4218_v35 = vpop.permute.xlu1 %4217 }
0x1278   : > { %v4220_v0 = vunpack.i.h.bf16 %v4218_v35  ;;  %v4219_v32 = vunpack.i.l.bf16 %v4218_v35  ;;  %v4301_v35 = vld [vmem:[%s4548_s16 + $0xb0] sm:$0xff]  }
0x127a   : > { %v2919_v33 = vsel %vm1130_vm3, %v4815_v28, %v4219_v32  ;;  %v2920_v36 = vsel %vm1130_vm3, %v4817_v30, %v4220_v0  ;;  %v4302_v0 = vld [vmem:[%s4548_s16 + $0xf8] sm:$0xff]  }
0x127b   : > { %v4223_v8 = vpop.permute.xlu1 %4222  ;;  %v2926_v34 = vpack.c.bf16 %v2920_v36, %v2919_v33  ;;  %v4303_v32 = vld [vmem:[%s4548_s16 + $0xb8] sm:$0xff]  }
0x127c   : > { %v4375_v37 = vpop.eup %4374  ;;  %v4225_v56 = vunpack.i.h.bf16 %v4223_v8  ;;  %v4224_v57 = vunpack.i.l.bf16 %v4223_v8 }
0x127d   : > { %v2775_v58 = vsel %vm1225_vm5, %v4375_v37, 0.0 }
0x127e   : > { %v4377_v23 = vpop.eup %4376  ;;  %v2918_v59 = vsel %vm1130_vm3, %v4729_v26, %v4225_v56  ;;  %v2917_v25 = vsel %vm1130_vm3, %v4727_v21, %v4224_v57  ;;  %2776 = vadd.xlane.f32.xlu0 %v2775_v58 }
0x127f   : > { %v2925_v28 = vpack.c.bf16 %v2918_v59, %v2917_v25  ;;  %v4233_v60 = vpop.permute.xlu1 %4232  ;;  %v2778_v14 = vsel %vm1225_vm5, %v4377_v23, 0.0 }
0x1280   : > { %v4235_v62 = vunpack.i.h.bf16 %v4233_v60  ;;  %v4234_v30 = vunpack.i.l.bf16 %v4233_v60 }
0x1282   : > { %v5024_v17 = vsel %vm1130_vm3, %v4905_v10, %v4235_v62  ;;  %v5028_v24 = vsel %vm1130_vm3, %v4903_v4, %v4234_v30  ;;  %2779 = vadd.xlane.f32.xlu0 %v2778_v14  ;;  %v4272_v10 = vld [vmem:[%s4548_s16 + $0x40] sm:$0xff]  }
0x1283   : > { %v2927_v21 = vpack.c.bf16 %v5024_v17, %v5028_v24 }
0x1298   : > { %2788 = vrot.lane.b32.xlu0 %v4937_v1, %s4437_s14 }
0x130b   : > { %v2777_v26 = vpop.xlane.xlu0 %2776 }
0x130c   : > { %4378 = vrcp.f32 %v2777_v26 }
0x130f   : > { %v2780_v18 = vpop.xlane.xlu0 %2779 }
0x1310   : > { %4380 = vrcp.f32 %v2780_v18 }
0x1313   : > { %v2789_v16 = vpop.permute.xlu0 %2788 }
0x1314   : > { %v2794_v22 = vsel %vm1253_vm4, %v2789_v16, 0 }
0x1315   : > { %4155 = vmatpush3.bf16.msra.mxu0 %v2794_v22 }
0x1316   : > { %v4379_v4 = vpop.eup %4378  ;;  %3918 = vmatprep.subr.bf16.mxu0 %v4272_v10 }
0x1317   : > { %v2783_v63 = vmul.f32 %v4379_v4, %v4375_v37  ;;  %v3796_v4 = vld [vmem:[%s5211_s30] ss:$0 sm:$0xff] }
0x1319   : > { %v2785_v20 = vpack.c.bf16 %v2783_v63, %v2783_v63 }
0x131a   : > { %v4381_v1 = vpop.eup %4380 }
0x131b   : > { %v2784_v15 = vmul.f32 %v4381_v1, %v4377_v23  ;;  %4157 = vmatmul.mubr.msk.bf16.vlgmr.msra.gmra.mrb[76].mxu0 %vm1225_vm5, %v2785_v20 }
0x131c   : > { %3919 = vmatpush3.bf16.msra.mxu0 %v4273_v2  ;;  %3224 = vmatprep.mubr.bf16.mxu0 %v2926_v34 }
0x131d   : > { %3920 = vmatprep.subr.bf16.mxu0 %v4274_v19  ;;  %v2786_v31 = vpack.c.bf16 %v2784_v15, %v2784_v15 }
0x131f   : > { %4163 = vmatmul.mubr.msk.bf16.vlgmr.msra.gmra.mrb[68].mxu1 %vm1225_vm5, %v2786_v31  ;;  %v4390_v31 = vld [vmem:[#allocation2] sm:$0xff] }
0x1320   : > { %3921 = vmatpush3.bf16.msra.mxu0 %v4275_v27  ;;  %3941 = vmatpush3.bf16.msra.mxu1 %v4289_v47  ;;  %v4304_v47 = vld [vmem:[%s4571_s5] sm:$0xff]  }
0x1321   : > { %3922 = vmatprep.subr.bf16.mxu0 %v4276_v7  ;;  %3942 = vmatprep.subr.bf16.mxu1 %v4290_v48  ;;  %v4305_v48 = vld [vmem:[%s4571_s5 + $0x8] sm:$0xff]   ;;  %s5212_s5 = scalar_lea.vmem %s5189_s7, %s4533_s20 }
0x1324   : > { %3923 = vmatpush3.bf16.msra.mxu0 %v4277_v12  ;;  %3943 = vmatpush3.bf16.msra.mxu1 %v4291_v49 }
0x1325   : > { %3924 = vmatprep.subr.bf16.mxu0 %v4278_v13  ;;  %3944 = vmatprep.subr.bf16.mxu1 %v4292_v50 }
0x1328   : > { %3925 = vmatpush3.bf16.msra.mxu0 %v4279_v11  ;;  %3945 = vmatpush3.bf16.msra.mxu1 %v4293_v51 }
0x1329   : > { %3926 = vmatprep.subr.bf16.mxu0 %v4280_v38  ;;  %3946 = vmatprep.subr.bf16.mxu1 %v4294_v52 }
0x132c   : > { %3927 = vmatpush3.bf16.msra.mxu0 %v4281_v39  ;;  %3947 = vmatpush3.bf16.msra.mxu1 %v4295_v53 }
0x132d   : > { %3928 = vmatprep.subr.bf16.mxu0 %v4282_v40  ;;  %3948 = vmatprep.subr.bf16.mxu1 %v4296_v54 }
0x1330   : > { %3929 = vmatpush3.bf16.msra.mxu0 %v4283_v41  ;;  %3949 = vmatpush3.bf16.msra.mxu1 %v4297_v3 }
0x1331   : > { %3930 = vmatprep.subr.bf16.mxu0 %v4284_v42  ;;  %3950 = vmatprep.subr.bf16.mxu1 %v4298_v55 }
0x1334   : > { %3931 = vmatpush3.bf16.msra.mxu0 %v4285_v43  ;;  %3951 = vmatpush3.bf16.msra.mxu1 %v4299_v29  ;;  %v3829_v29 = vld [vmem:[%s5212_s5] ss:$0 sm:$0xff] }
0x1335   : > { %3932 = vmatprep.subr.bf16.mxu0 %v4286_v44  ;;  %3952 = vmatprep.subr.bf16.mxu1 %v4300_v6 }
0x1338   : > { %3933 = vmatpush3.bf16.msra.mxu0 %v4287_v45  ;;  %3953 = vmatpush3.bf16.msra.mxu1 %v4301_v35 }
0x1339   : > { %4166 = vmatprep.subr.bf16.mxu0 %v4435_v61  ;;  %3954 = vmatprep.subr.bf16.mxu1 %v4302_v0 }
0x133b   : > { %3225 = vmatmul.mubr.bf16.vlgmr.msra.gmra.mrb[80].mxu0 %v2925_v28 }
0x133c   : > { %4170 = vmatprep.mubr.msk.bf16.mxu0 %vm4436_vm2, %v4435_v61  ;;  %3955 = vmatpush3.bf16.msra.mxu1 %v4303_v32  ;;  %v3830_v32 = vld [vmem:[%s622_s3] ss:$0 sm:$0xff] }
0x133d   : > { %4174 = vmatprep.subr.bf16.mxu1 %v4435_v61  ;;  %4167 = vmatpush3.bf16.msra.mxu0 %v4304_v47 }
0x133e   : > { %4168 = vmatprep.subr.bf16.mxu0 %v4435_v61 }
0x1341   : > { %4169 = vmatpush3.bf16.msra.mxu0 %v4305_v48 }
0x13ee   : > { %v2830_v33 = vpop.f32.mrb[76].mxu0 }
0x13ef   : > { %v4158_v36 = vpop.f32.mrb[77].mxu0 }
0x13f0   : > { %v2833_v8 = vpop.f32.mrb[78].mxu0 }
0x13f1   : > { %v4159_v34 = vpop.f32.mrb[79].mxu0 }
0x13f2   : > { %v2879_v37 = vpop.f32.mrb[68].mxu1 }
0x13f3   : > { %v4226_v56 = vpack.i.bf16 %v2879_v37, %v2830_v33  ;;  %v4164_v57 = vpop.f32.mrb[69].mxu1  ;;  %v4306_v37 = vld [vmem:[%s4585_s26] sm:$0xff]  }
0x13f4   : > { %v2882_v58 = vpop.f32.mrb[70].mxu1  ;;  %v4308_v57 = vld [vmem:[%s4585_s26 + $0x10] sm:$0xff]  }
0x13f5   : > { %4227 = vrot.lane.b32.xlu0 %v4226_v56, %s4437_s14  ;;  %v4165_v23 = vpop.f32.mrb[71].mxu1  ;;  %v4307_v56 = vld [vmem:[%s4585_s26 + $0x8] sm:$0xff]   ;;  %v4309_v58 = vld [vmem:[%s4585_s26 + $0x18] sm:$0xff]  }
0x13f6   : > { %v4310_v23 = vld [vmem:[%s4585_s26 + $0x20] sm:$0xff]  }
0x140e   : > { %v3934_v59 = vpop.f32.mrb[80].mxu0 }
0x140f   : > { %v3935_v25 = vpop.f32.mrb[81].mxu0 }
0x1410   : > { %v3936_v28 = vadd.f32 %v3935_v25, %v3934_v59  ;;  %v3937_v60 = vpop.f32.mrb[82].mxu0  ;;  %v4311_v59 = vld [vmem:[%s4585_s26 + $0x28] sm:$0xff]   ;;  %v4312_v25 = vld [vmem:[%s4585_s26 + $0x30] sm:$0xff]  }
0x1411   : > { %v3938_v62 = vpop.f32.mrb[83].mxu0 }
0x1412   : > { %v3939_v30 = vadd.f32 %v3938_v62, %v3937_v60  ;;  %v3831_v60 = vld [vmem:[%s630_s15] ss:$0 sm:$0xff] }
0x1414   : > { %v3230_v1 = vadd.f32 %v3939_v30, %v3796_v4 }
0x1467   : > { %v4228_v14 = vpop.permute.xlu0 %4227 }
0x1468   : > { %v4230_v26 = vunpack.i.h.bf16 %v4228_v14  ;;  %v4229_v18 = vunpack.i.l.bf16 %v4228_v14 }
0x146a   : > { %v2923_v10 = vsel %vm1130_vm3, %v4991_v5, %v4229_v18  ;;  %v2924_v16 = vsel %vm1130_vm3, %v4993_v9, %v4230_v26  ;;  %v3227_v5 = vadd.f32 %v3936_v28, %v3796_v4  ;;  %v4313_v28 = vld [vmem:[%s4585_s26 + $0x38] sm:$0xff]  }
0x146b   : > { %v2928_v22 = vpack.c.bf16 %v2924_v16, %v2923_v10 }
0x146d   : > { %3265 = vmatprep.mubr.bf16.mxu1 %v2928_v22 }
0x146e   : > { %3266 = vmatmul.mubr.bf16.vlgmr.msra.gmra.mrb[72].mxu1 %v2927_v21  ;;  %v4391_v21 = vld [vmem:[#allocation2 + $0x8] sm:$0xff] }
0x146f   : > { %4190 = vmatprep.mubr.msk.bf16.mxu1 %vm4436_vm2, %v4435_v61  ;;  %4175 = vmatpush3.bf16.msra.mxu1 %v4306_v37  ;;  %v3846_v37 = vld [vmem:[%s5214_s29] ss:$0 sm:$0xff] (!%p3844_p5) }
0x1470   : > { %4176 = vmatprep.subr.bf16.mxu1 %v4435_v61 }
0x1473   : > { %4177 = vmatpush3.bf16.msra.mxu1 %v4307_v56 }
0x1474   : > { %4178 = vmatprep.subr.bf16.mxu1 %v4435_v61 }
0x1477   : > { %4179 = vmatpush3.bf16.msra.mxu1 %v4308_v57 }
0x1478   : > { %4180 = vmatprep.subr.bf16.mxu1 %v4435_v61 }
0x147b   : > { %4181 = vmatpush3.bf16.msra.mxu1 %v4309_v58 }
0x147c   : > { %4182 = vmatprep.subr.bf16.mxu1 %v4435_v61 }
0x147f   : > { %4183 = vmatpush3.bf16.msra.mxu1 %v4310_v23 }
0x1480   : > { %4184 = vmatprep.subr.bf16.mxu1 %v4435_v61 }
0x1483   : > { %4185 = vmatpush3.bf16.msra.mxu1 %v4311_v59 }
0x1484   : > { %4186 = vmatprep.subr.bf16.mxu1 %v4435_v61 }
0x1487   : > { %4187 = vmatpush3.bf16.msra.mxu1 %v4312_v25 }
0x1488   : > { %4188 = vmatprep.subr.bf16.mxu1 %v4435_v61 }
0x148b   : > { %4189 = vmatpush3.bf16.msra.mxu1 %v4313_v28 }
0x1541   : > { %v3956_v63 = vpop.f32.mrb[72].mxu1 }
0x1542   : > { %v3957_v2 = vpop.f32.mrb[73].mxu1 }
0x1543   : > { %v3958_v20 = vadd.f32 %v3957_v2, %v3956_v63  ;;  %v3959_v19 = vpop.f32.mrb[74].mxu1 }
0x1544   : > { %v3960_v9 = vpop.f32.mrb[75].mxu1 }
0x1545   : > { %v3268_v15 = vadd.f32 %v3958_v20, %v3227_v5  ;;  %v3961_v27 = vadd.f32 %v3960_v9, %v3959_v19 }
0x1547   : > { %v5088_v17 = vadd.f32 %v4390_v31, %v3268_v15  ;;  %v3271_v24 = vadd.f32 %v3961_v27, %v3230_v1 }
0x1549   : > { %v5090_v7 = vadd.f32 %v4391_v21, %v3271_v24  ;;  %v3278_v12 = vsel %vm656_vm1, %v5088_v17, 0.0 }
0x154a   : > { %3279 = vadd.xlane.f32.xlu0 %v3278_v12 }
0x154b   : > { %v3281_v13 = vsel %vm656_vm1, %v5090_v7, 0.0 }
0x154c   : > { %3282 = vadd.xlane.f32.xlu1 %v3281_v13 }
0x15d7   : > { %v3280_v11 = vpop.xlane.xlu0 %3279 }
0x15d8   : > { %v3284_v38 = vmul.f32 0.03125, %v3280_v11 }
0x15d9   : > { %v3283_v39 = vpop.xlane.xlu1 %3282 }
0x15da   : > { %v3286_v40 = vsub.f32 %v5088_v17, %v3284_v38  ;;  %v3285_v41 = vmul.f32 0.03125, %v3283_v39  ;;  %v3835_v38 = vld [vmem:[%s638_s13] ss:$0 sm:$0xff] }
0x15dc   : > { %v3287_v42 = vsub.f32 %v5090_v7, %v3285_v41  ;;  %v3288_v43 = vmul.f32 %v3286_v40, %v3286_v40 }
0x15de   : > { %v3290_v44 = vsel %vm656_vm1, %v3288_v43, 0.0  ;;  %v3289_v45 = vmul.f32 %v3287_v42, %v3287_v42 }
0x15df   : > { %3291 = vadd.xlane.f32.xlu0 %v3290_v44 }
0x15e0   : > { %v3293_v46 = vsel %vm656_vm1, %v3289_v45, 0.0 }
0x15e3   : > { %3294 = vadd.xlane.f32.xlu0 %v3293_v46 }
0x166c   : > { %v3292_v49 = vpop.xlane.xlu0 %3291 }
0x166d   : > { %v3296_v50 = vmul.f32 0.03125, %v3292_v49 }
0x166f   : > { %v3298_v51 = vadd.f32 1e-05, %v3296_v50 }
0x1670   : > { %v3295_v52 = vpop.xlane.xlu0 %3294 }
0x1671   : > { %4382 = vrsqrt.f32 %v3298_v51  ;;  %v3297_v53 = vmul.f32 0.03125, %v3295_v52 }
0x1673   : > { %v3299_v54 = vadd.f32 1e-05, %v3297_v53 }
0x1675   : > { %4384 = vrsqrt.f32 %v3299_v54 }
0x167b   : > { %v4383_v3 = vpop.eup %4382 }
0x167c   : > { %v3302_v55 = vmul.f32 %v4383_v3, %v3286_v40 }
0x167e   : > { %v3310_v35 = vmul.f32 %v3829_v29, %v3302_v55 }
0x167f   : > { %v4385_v6 = vpop.eup %4384 }
0x1680   : > { %v3303_v0 = vmul.f32 %v4385_v6, %v3287_v42  ;;  %v3318_v36 = vadd.f32 %v3830_v32, %v3310_v35 }
0x1682   : > { %v3311_v33 = vmul.f32 %v3829_v29, %v3303_v0 }
0x1684   : > { %v3319_v8 = vadd.f32 %v3830_v32, %v3311_v33 }
0x1686   : > { %v3320_v34 = vpack.c.bf16 %v3319_v8, %v3318_v36  ;;  %v3845_v8 = vld [vmem:[%s5213_s27] ss:$0 sm:$0xff] (!%p3844_p5) }
0x1688   : > { %4171 = vmatmul.mubr.msk.bf16.vlgmr.msra.gmra.mrb[84].mxu0 %vm656_vm1, %v3320_v34 }
0x175b   : > { %v3381_v62 = vpop.f32.mrb[84].mxu0 }
0x175c   : > { %v3382_v30 = vadd.f32 %v3831_v60, %v3381_v62  ;;  %v4172_v14 = vpop.f32.mrb[85].mxu0 }
0x175d   : > { %v3384_v26 = vpop.f32.mrb[86].mxu0 }
0x175e   : > { %v3388_v18 = vmul.f32 %v3382_v30, %v3382_v30  ;;  %v3385_v10 = vadd.f32 %v3831_v60, %v3384_v26  ;;  %v4173_v16 = vpop.f32.mrb[87].mxu0 }
0x1760   : > { %v3390_v22 = vmul.f32 %v3388_v18, %v3382_v30  ;;  %v3389_v4 = vmul.f32 %v3385_v10, %v3385_v10 }
0x1762   : > { %v3392_v63 = vmul.f32 0.044715, %v3390_v22  ;;  %v3391_v2 = vmul.f32 %v3389_v4, %v3385_v10 }
0x1764   : > { %v3394_v5 = vadd.f32 %v3392_v63, %v3382_v30  ;;  %v3393_v61 = vmul.f32 0.044715, %v3391_v2 }
0x1766   : > { %v3396_v20 = vmul.f32 0.7978846, %v3394_v5  ;;  %v3395_v19 = vadd.f32 %v3393_v61, %v3385_v10 }
0x1768   : > { %4386 = vtanh.f32 %v3396_v20  ;;  %v3397_v9 = vmul.f32 0.7978846, %v3395_v19 }
0x176a   : > { %4388 = vtanh.f32 %v3397_v9 }
0x1772   : > { %v4387_v1 = vpop.eup %4386 }
0x1773   : > { %v3400_v15 = vadd.f32 1.0, %v4387_v1 }
0x1774   : > { %v4389_v27 = vpop.eup %4388 }
0x1775   : > { %v3402_v31 = vmul.f32 0.5, %v3400_v15  ;;  %v3401_v24 = vadd.f32 1.0, %v4389_v27 }
0x1777   : > { %v3403_v21 = vmul.f32 0.5, %v3401_v24  ;;  %v3404_v12 = vmul.f32 %v3402_v31, %v3382_v30 }
0x1779   : > { %v3405_v13 = vmul.f32 %v3403_v21, %v3385_v10 }
0x177b   : > { %v3406_v11 = vpack.c.bf16 %v3405_v13, %v3404_v12 }
0x177d   : > { %4191 = vmatmul.mubr.bf16.vlgmr.msra.gmra.mrb[76].mxu1 %v3406_v11 }
0x1850   : > { %v3512_v39 = vpop.f32.mrb[76].mxu1 }
0x1851   : > { %v3513_v40 = vadd.f32 %v3835_v38, %v3512_v39  ;;  %v4192_v41 = vpop.f32.mrb[77].mxu1  ;;  %3526 = sbr.rel (%p3844_p5) target bundleno = 6547 (0x1993), region = 88 }
0x1852   : > { %v3515_v42 = vpop.f32.mrb[78].mxu1 }
0x1853   : > { %v3519_v43 = vadd.f32 %v3513_v40, %v5088_v17  ;;  %v3516_v44 = vadd.f32 %v3835_v38, %v3515_v42  ;;  %v4193_v45 = vpop.f32.mrb[79].mxu1 }
0x1855   : > { %3521 = vst.msk [vmem:[#allocation2] sm:$0xff] %vm656_vm1, %v3519_v43  ;;  %v3520_v46 = vadd.f32 %v3516_v44, %v5090_v7  ;;  %v3529_v47 = vsel (!%p3844_p5), %vm656_vm1, %v3519_v43, 0.0 }
0x1856   : > { %3530 = vadd.xlane.f32.xlu0 (!%p3844_p5), %v3529_v47 }
0x1857   : > { %3522 = vst.msk [vmem:[#allocation2 + $0x8] sm:$0xff] %vm656_vm1, %v3520_v46  ;;  %v3532_v48 = vsel (!%p3844_p5), %vm656_vm1, %v3520_v46, 0.0 }
0x185a   : > { %3533 = vadd.xlane.f32.xlu0 %v3532_v48 }
0x18e3   : > { %v3531_v49 = vpop.xlane.xlu0 %3530 }
0x18e4   : > { %v3535_v50 = vmul.f32 0.03125, %v3531_v49 }
0x18e6   : > { %v3537_v17 = vsub.f32 %v3519_v43, %v3535_v50 }
0x18e7   : > { %v3534_v51 = vpop.xlane.xlu0 %3533 }
0x18e8   : > { %v3536_v52 = vmul.f32 0.03125, %v3534_v51  ;;  %v3539_v53 = vmul.f32 %v3537_v17, %v3537_v17 }
0x18ea   : > { %v3538_v54 = vsub.f32 %v3520_v46, %v3536_v52  ;;  %v3541_v7 = vsel %vm656_vm1, %v3539_v53, 0.0 }
0x18eb   : > { %3542 = vadd.xlane.f32.xlu1 %v3541_v7 }
0x18ec   : > { %v3540_v3 = vmul.f32 %v3538_v54, %v3538_v54 }
0x18ee   : > { %v3544_v55 = vsel %vm656_vm1, %v3540_v3, 0.0 }
0x18ef   : > { %3545 = vadd.xlane.f32.xlu1 %v3544_v55 }
0x1978   : > { %v3543_v29 = vpop.xlane.xlu1 %3542 }
0x1979   : > { %v3547_v6 = vmul.f32 0.03125, %v3543_v29 }
0x197b   : > { %v3549_v35 = vadd.f32 1e-05, %v3547_v6 }
0x197c   : > { %v3546_v0 = vpop.xlane.xlu1 %3545 }
0x197d   : > { %4392 = vrsqrt.f32 %v3549_v35  ;;  %v3548_v32 = vmul.f32 0.03125, %v3546_v0 }
0x197f   : > { %v3550_v33 = vadd.f32 1e-05, %v3548_v32 }
0x1981   : > { %4394 = vrsqrt.f32 %v3550_v33 }
0x1987   : > { %v4393_v36 = vpop.eup %4392 }
0x1988   : > { %v3553_v34 = vmul.f32 %v4393_v36, %v3537_v17 }
0x198a   : > { %v3561_v56 = vmul.f32 %v3845_v8, %v3553_v34 }
0x198b   : > { %v4395_v57 = vpop.eup %4394 }
0x198c   : > { %v3569_v58 = vadd.f32 %v3846_v37, %v3561_v56  ;;  %v3554_v23 = vmul.f32 %v4395_v57, %v3538_v54 }
0x198e   : > { %3571 = vst.msk [vmem:[#allocation3] sm:$0xff] %vm656_vm1, %v3569_v58  ;;  %v3562_v59 = vmul.f32 %v3845_v8, %v3554_v23 }
0x1990   : > { %v3570_v25 = vadd.f32 %v3846_v37, %v3562_v59 }
0x1992   : > { %3572 = vst.msk [vmem:[#allocation3 + $0x8] sm:$0xff] %vm656_vm1, %v3570_v25 }
0x1993 PF: > { %p4199_p6 = scmp.eq.s32.totalorder %s4527_s19, 1  ;;  %s4438_s14 = smov [#allocation3]  }
0x1994   : > { %s3579_s16 = sshll.u32 %s4438_s14, 4  ;;  %s3580_s16 = int_to_ptr.vmem [resolvable:$true] %s3579_s16 }
0x1995   : > { %s4396_s28 = scalar_lea.vmem %s3580_s16, 256  ;;  %p4403_p10 = scmp.lt.s32.totalorder %s3580_s16, %s3580_s16 }
0x1996   : > { %p4397_p7 = scmp.ne.s32.totalorder %s3580_s16, %s4396_s28  ;;  %p4404_p11 = scmp.lt.s32.totalorder %s4396_s28, %s4396_s28 }
0x1998   : > { %p4398_p8 = pnand %p4397_p7, %p4199_p6  ;;  %p4405_p12 = por %p4404_p11, %p4403_p10 }
0x199a   : > { %p4399_p9 = pneg %p4398_p8 }
0x199c   : > { %p4406_p13 = pnand %p4405_p12, %p4399_p9 }
0x199e   : > { %4409 = shalt.err (!%p4406_p13)
}
0x199f   : > { %s5215_s22 = sld [smem:[#allocation11_spill]] }
0x19a5   : > { %s4410_s5 = scalar_lea.hbm %s5215_s22, 256 }
0x19a6   : > { %p4411_p0 = scmp.ne.s32.totalorder %s5215_s22, %s4410_s5  ;;  %p4416_p3 = scmp.lt.u32.totalorder %s4410_s5, %s5215_s22 }
0x19a8   : > { %p4412_p1 = pnand %p4411_p0, %p4199_p6 }
0x19aa   : > { %p4413_p2 = pneg %p4412_p1 }
0x19ac   : > { %p4418_p4 = pnand %p4416_p3, %p4413_p2 }
0x19ae   : > { %4421 = shalt.err (!%p4418_p4)
}
0x19af   : > { %s4439_s15 = smov 128   ;;  %s4440_s26 = smov 8  }
0x19b0   : > { %4196 = dma.vmem_to_hbm [thread:$0]  (%p4199_p6), %s3580_s16, 256, %s5215_s22, [#allocation4], %s4439_s15, %s4439_s15, %s4440_s26  }
0x19b1   : > { %4427 = dma.done.wait (%p4199_p6), [#allocation4], 256  }
0x19b2   : > { %4429 = vsyncadd (%p4199_p6), [#allocation4], 4294967040 }
0x19b3 PF: > { %s5216_s27 = sld [smem:[#allocation6_spill]] }
0x19b9   : > { %s26_s18 = sadd.s32 1, %s5216_s27  }
0x19ba   : > { %p23_p5 = scmp.ge.s32.totalorder %s26_s18, 4  }
0x19bc   :  { %25 = sbr.rel (!%p23_p5) target bundleno = 7 (0x7), region = 145 }
0x19c3   :  { %3595 = vsyncpa [#allocation4], 1 }
0x19c4   :  { %3597 = vsyncpa [#allocation4 + $0x1], 1 }

</bundles_post_ra>
